<compile_context>
chip_gen: v6e
topology: v6e:2x2x1
jax: 0.10.0
libtpu: 0.0.40
codegen_flags: <defaults>
</compile_context>

<pallas_src>
import math
import functools

import jax
import jax.numpy as jnp
from jax.experimental import pallas as pl
from jax.experimental.pallas import tpu as pltpu

NEG_INF = -1e30  # finite "masked" value (avoids -inf - -inf NaNs in the online softmax)


def _vmem_limit_bytes():
    """~80% of physical VMEM, capped at 100 MiB (v5e/v6e: 128 MiB, v7x: 64 MiB)."""
    cap = 64 * 1024 * 1024
    try:
        info = pltpu.get_tpu_info()
        cap = getattr(info, "vmem_capacity_bytes", cap) or cap
    except Exception:  # not on TPU / old runtime
        pass
    return int(min(cap * 0.8, 100 * 1024 * 1024))


VMEM_LIMIT = _vmem_limit_bytes()


def _params(sem):
    return pltpu.CompilerParams(dimension_semantics=sem, vmem_limit_bytes=VMEM_LIMIT)


# ---------------------------------------------------------------------------
# Tile picking (respects the (8, 128) block rule: divisible or full-dim)
# ---------------------------------------------------------------------------

def _pick_tile(dim, target, align, prefer_split=False):
    """Largest divisor of `dim` that is a multiple of `align` and <= target.
    Falls back to the full dim (always legal).  With prefer_split, cap at dim//2 so
    parallel row axes get >=2 grid steps (keeps both v7x TensorCores busy)."""
    if dim % align != 0:
        return dim
    cap = min(target, dim)
    if prefer_split and dim >= 2 * align:
        cap = min(cap, dim // 2)
    t = (cap // align) * align
    while t >= align:
        if dim % t == 0:
            return t
        t -= align
    return dim


# ---------------------------------------------------------------------------
# Pallas kernels
# ---------------------------------------------------------------------------

def _layernorm_kernel(x_ref, o_ref, *, eps):
    """o = LayerNorm(x, no affine), stored bf16 (hoisted out of the matmul kernels)."""
    x = x_ref[...]
    mu = jnp.mean(x, axis=-1, keepdims=True)
    xc = x - mu
    var = jnp.mean(xc * xc, axis=-1, keepdims=True)
    o_ref[...] = (xc * jax.lax.rsqrt(var + eps)).astype(o_ref.dtype)


def _matmul_bias_kernel(x_ref, w_ref, b_ref, o_ref, acc_ref):
    """o = (x @ W + b) in bf16; K-reduction tiled with f32 accumulator scratch."""
    k = pl.program_id(2)

    @pl.when(k == 0)
    def _():
        acc_ref[...] = jnp.zeros_like(acc_ref)

    acc_ref[...] += jnp.dot(x_ref[...], w_ref[...], preferred_element_type=jnp.float32)

    @pl.when(k == pl.num_programs(2) - 1)
    def _():
        o_ref[...] = (acc_ref[...] + b_ref[...]).astype(o_ref.dtype)


def _matmul_ln_res_kernel(x_ref, w_ref, b_ref, g_ref, beta_ref, res_ref, o_ref, acc_ref, *, eps):
    """o = res + LayerNorm_affine(x @ W + b); K-tiled, N = D full (LN needs the whole row)."""
    k = pl.program_id(1)

    @pl.when(k == 0)
    def _():
        acc_ref[...] = jnp.zeros_like(acc_ref)

    acc_ref[...] += jnp.dot(x_ref[...], w_ref[...], preferred_element_type=jnp.float32)

    @pl.when(k == pl.num_programs(1) - 1)
    def _():
        h = acc_ref[...] + b_ref[...]
        mu = jnp.mean(h, axis=-1, keepdims=True)
        hc = h - mu
        var = jnp.mean(hc * hc, axis=-1, keepdims=True)
        o_ref[...] = res_ref[...] + hc * jax.lax.rsqrt(var + eps) * g_ref[...] + beta_ref[...]


def _ffn_in_kernel(x_ref, wa_ref, wb_ref, o_ref, acca_ref, accg_ref, *, eps):
    """o = LayerNorm(GeGLU(x @ [Wa | Wb])); x is already pre-LayerNormed bf16.
    K (=D) reduction tiled with two f32 accumulators so weight VMEM stays bounded."""
    k = pl.program_id(1)

    @pl.when(k == 0)
    def _():
        acca_ref[...] = jnp.zeros_like(acca_ref)
        accg_ref[...] = jnp.zeros_like(accg_ref)

    xb = x_ref[...]
    acca_ref[...] += jnp.dot(xb, wa_ref[...], preferred_element_type=jnp.float32)
    accg_ref[...] += jnp.dot(xb, wb_ref[...], preferred_element_type=jnp.float32)

    @pl.when(k == pl.num_programs(1) - 1)
    def _():
        a = acca_ref[...]
        g = accg_ref[...]
        c = 0.7978845608028654  # sqrt(2/pi) -> gelu(approximate='tanh')
        gelu = 0.5 * g * (1.0 + jnp.tanh(c * (g + 0.044715 * g * g * g)))
        y = a * gelu
        mu = jnp.mean(y, axis=-1, keepdims=True)
        yc = y - mu
        var = jnp.mean(yc * yc, axis=-1, keepdims=True)
        o_ref[...] = (yc * jax.lax.rsqrt(var + eps)).astype(o_ref.dtype)


def _matmul_res_kernel(x_ref, w_ref, res_ref, o_ref, acc_ref):
    """o = res + x @ W (f32 residual stream); K and N tiled, f32 accumulator."""
    k = pl.program_id(2)

    @pl.when(k == 0)
    def _():
        acc_ref[...] = jnp.zeros_like(acc_ref)

    acc_ref[...] += jnp.dot(x_ref[...], w_ref[...], preferred_element_type=jnp.float32)

    @pl.when(k == pl.num_programs(2) - 1)
    def _():
        o_ref[...] = res_ref[...] + acc_ref[...]


def _attn_kernel(q_ref, k_ref, v_ref, bias_ref, o_ref, m_sc, l_sc, acc_sc, *, heads, hs):
    """Flash-style attention for one (batch, q-tile) block, tiled over kv; all heads per step.

    q_ref: (1, tq, D) bf16 (softmax scale already folded into the Q projection)
    k_ref/v_ref: (1, tk, D) bf16; bias_ref: (1, H, tq, tk) bf16 (rel-pos bias + additive mask)
    o_ref: (1, tq, D) bf16 written lane-dense in the residual-stream layout.
    Scratch (f32): m/l (H, tq, 1), acc (H, tq, hs).
    """
    kv = pl.program_id(2)

    @pl.when(kv == 0)
    def _():
        m_sc[...] = jnp.full_like(m_sc, -jnp.inf)
        l_sc[...] = jnp.zeros_like(l_sc)
        acc_sc[...] = jnp.zeros_like(acc_sc)

    q_all = q_ref[0]   # (tq, D) bf16
    k_all = k_ref[0]   # (tk, D) bf16
    v_all = v_ref[0]   # (tk, D) bf16

    for h in range(heads):
        sl = slice(h * hs, (h + 1) * hs)
        q_h = q_all[:, sl]
        k_h = k_all[:, sl]
        v_h = v_all[:, sl]
        # (tq, tk) scores: contract on the last dim of both -> no explicit K transpose.
        s = jax.lax.dot_general(q_h, k_h, (((1,), (1,)), ((), ())),
                                preferred_element_type=jnp.float32)
        s = s + bias_ref[0, h].astype(jnp.float32)

        m_prev = m_sc[h]
        m_new = jnp.maximum(m_prev, jnp.max(s, axis=-1, keepdims=True))
        alpha = jnp.exp(m_prev - m_new)
        p = jnp.exp(s - m_new)                       # masked entries underflow to exactly 0
        l_sc[h] = alpha * l_sc[h] + jnp.sum(p, axis=-1, keepdims=True)
        acc_sc[h] = alpha * acc_sc[h] + jnp.dot(p.astype(jnp.bfloat16), v_h,
                                                preferred_element_type=jnp.float32)
        m_sc[h] = m_new

    @pl.when(kv == pl.num_programs(2) - 1)
    def _():
        for h in range(heads):
            inv = pl.reciprocal(l_sc[h], approx=False)
            o_ref[0, :, h * hs:(h + 1) * hs] = (acc_sc[h] * inv).astype(o_ref.dtype)


# ---------------------------------------------------------------------------
# Pallas wrappers
# ---------------------------------------------------------------------------

def layernorm(x, eps):
    M, D = x.shape
    tm = _pick_tile(M, 512, 8, prefer_split=True)
    return pl.pallas_call(
        functools.partial(_layernorm_kernel, eps=eps),
        grid=(M // tm,),
        in_specs=[pl.BlockSpec((tm, D), lambda i: (i, 0))],
        out_specs=pl.BlockSpec((tm, D), lambda i: (i, 0)),
        out_shape=jax.ShapeDtypeStruct((M, D), jnp.bfloat16),
        compiler_params=_params(("parallel",)),
    )(x)


def matmul_bias(x, w, b):
    """(M,K) bf16 @ (K,N) bf16 + (1,N) f32 -> (M,N) bf16, K-reduction tiled."""
    M, K = x.shape
    N = w.shape[1]
    tm = _pick_tile(M, 256, 8, prefer_split=True)
    tn = _pick_tile(N, 512, 128)
    tk = _pick_tile(K, 512, 128)
    return pl.pallas_call(
        _matmul_bias_kernel,
        grid=(M // tm, N // tn, K // tk),
        in_specs=[
            pl.BlockSpec((tm, tk), lambda i, j, k: (i, k)),
            pl.BlockSpec((tk, tn), lambda i, j, k: (k, j)),
            pl.BlockSpec((1, tn), lambda i, j, k: (0, j)),
        ],
        out_specs=pl.BlockSpec((tm, tn), lambda i, j, k: (i, j)),
        out_shape=jax.ShapeDtypeStruct((M, N), jnp.bfloat16),
        scratch_shapes=[pltpu.VMEM((tm, tn), jnp.float32)],
        compiler_params=_params(("parallel", "parallel", "arbitrary")),
    )(x, w, b)


def matmul_ln_res(x, w, b, gamma, beta, res, eps):
    M, K = x.shape
    D = w.shape[1]
    tm = _pick_tile(M, 256, 8, prefer_split=True)
    tk = _pick_tile(K, 512, 128)
    return pl.pallas_call(
        functools.partial(_matmul_ln_res_kernel, eps=eps),
        grid=(M // tm, K // tk),
        in_specs=[
            pl.BlockSpec((tm, tk), lambda i, k: (i, k)),
            pl.BlockSpec((tk, D), lambda i, k: (k, 0)),
            pl.BlockSpec((1, D), lambda i, k: (0, 0)),
            pl.BlockSpec((1, D), lambda i, k: (0, 0)),
            pl.BlockSpec((1, D), lambda i, k: (0, 0)),
            pl.BlockSpec((tm, D), lambda i, k: (i, 0)),
        ],
        out_specs=pl.BlockSpec((tm, D), lambda i, k: (i, 0)),
        out_shape=jax.ShapeDtypeStruct((M, D), jnp.float32),
        scratch_shapes=[pltpu.VMEM((tm, D), jnp.float32)],
        compiler_params=_params(("parallel", "arbitrary")),
    )(x, w, b, gamma, beta, res)


def ffn_in(x, w1a, w1b, eps):
    M, D = x.shape
    I = w1a.shape[1]
    tm = _pick_tile(M, 128, 8, prefer_split=True)
    tk = _pick_tile(D, 256, 128)
    return pl.pallas_call(
        functools.partial(_ffn_in_kernel, eps=eps),
        grid=(M // tm, D // tk),
        in_specs=[
            pl.BlockSpec((tm, tk), lambda i, k: (i, k)),
            pl.BlockSpec((tk, I), lambda i, k: (k, 0)),
            pl.BlockSpec((tk, I), lambda i, k: (k, 0)),
        ],
        out_specs=pl.BlockSpec((tm, I), lambda i, k: (i, 0)),
        out_shape=jax.ShapeDtypeStruct((M, I), jnp.bfloat16),
        scratch_shapes=[pltpu.VMEM((tm, I), jnp.float32),
                        pltpu.VMEM((tm, I), jnp.float32)],
        compiler_params=_params(("parallel", "arbitrary")),
    )(x, w1a, w1b)


def matmul_res(x, w, res):
    M, K = x.shape
    N = w.shape[1]
    tm = _pick_tile(M, 256, 8, prefer_split=True)
    tn = _pick_tile(N, 512, 128)
    tk = _pick_tile(K, 512, 128)
    return pl.pallas_call(
        _matmul_res_kernel,
        grid=(M // tm, N // tn, K // tk),
        in_specs=[
            pl.BlockSpec((tm, tk), lambda i, j, k: (i, k)),
            pl.BlockSpec((tk, tn), lambda i, j, k: (k, j)),
            pl.BlockSpec((tm, tn), lambda i, j, k: (i, j)),
        ],
        out_specs=pl.BlockSpec((tm, tn), lambda i, j, k: (i, j)),
        out_shape=jax.ShapeDtypeStruct((M, N), jnp.float32),
        scratch_shapes=[pltpu.VMEM((tm, tn), jnp.float32)],
        compiler_params=_params(("parallel", "parallel", "arbitrary")),
    )(x, w, res)


def attention_core(q, k, v, bias, *, heads, hs):
    """q: (B,Tq,D) bf16, k/v: (B,Tk,D) bf16, bias: (B,H,Tq,Tk) bf16 -> (B,Tq,D) bf16."""
    B, Tq, D = q.shape
    Tk = k.shape[1]
    tq = _pick_tile(Tq, 128, 8)
    tk = _pick_tile(Tk, 512, 128)
    kernel = functools.partial(_attn_kernel, heads=heads, hs=hs)
    return pl.pallas_call(
        kernel,
        grid=(B, Tq // tq, Tk // tk),
        in_specs=[
            pl.BlockSpec((1, tq, D), lambda b, qi, kv: (b, qi, 0)),
            pl.BlockSpec((1, tk, D), lambda b, qi, kv: (b, kv, 0)),
            pl.BlockSpec((1, tk, D), lambda b, qi, kv: (b, kv, 0)),
            pl.BlockSpec((1, heads, tq, tk), lambda b, qi, kv: (b, 0, qi, kv)),
        ],
        out_specs=pl.BlockSpec((1, tq, D), lambda b, qi, kv: (b, qi, 0)),
        out_shape=jax.ShapeDtypeStruct((B, Tq, D), jnp.bfloat16),
        scratch_shapes=[
            pltpu.VMEM((heads, tq, 1), jnp.float32),   # running max
            pltpu.VMEM((heads, tq, 1), jnp.float32),   # running denom
            pltpu.VMEM((heads, tq, hs), jnp.float32),  # per-head output accumulator
        ],
        compiler_params=_params(("parallel", "parallel", "arbitrary")),
    )(q, k, v, bias)


# ---------------------------------------------------------------------------
# Position bucketing (matches Attention.make_log_bucket_position)
# ---------------------------------------------------------------------------

def make_log_bucket_position(relative_pos, bucket_size, max_position):
    sign = jnp.sign(relative_pos)
    mid = bucket_size // 2
    abs_pos = jnp.where((relative_pos < mid) & (relative_pos > -mid),
                        mid - 1, jnp.abs(relative_pos))
    log_pos = (jnp.ceil(jnp.log(abs_pos / mid) / math.log((max_position - 1) / mid)
                        * (mid - 1)).astype(jnp.int32) + mid)
    return jnp.where(abs_pos <= mid, relative_pos, log_pos * sign)


def build_position_indices(cfg):
    mp = cfg['max_position_embeddings']
    rel = jnp.arange(mp, dtype=jnp.int32)[:, None] - jnp.arange(mp, dtype=jnp.int32)[None, :]
    bp = make_log_bucket_position(rel, cfg['position_bucket_size'], mp)
    return (cfg['position_bucket_size'] - 1 + bp).astype(jnp.int32)


# ---------------------------------------------------------------------------
# Parameter init (deterministic; matches shapes/init scheme of the module)
# ---------------------------------------------------------------------------

def trunc_normal(key, shape, std):
    return std * jax.random.truncated_normal(key, -2.0, 2.0, shape, dtype=jnp.float32)


def init_attention(key, D, scale):
    std = math.sqrt(2.0 / (5.0 * D))
    kq, kk, kv, ko = jax.random.split(key, 4)
    return dict(
        # The softmax scale (1/sqrt(3*hs)) is folded into the Q projection (weight + bias):
        # it then propagates for free into the main QK term and both c2p/p2c position terms.
        wq=(trunc_normal(kq, (D, D), std) * scale).astype(jnp.bfloat16),
        bq=jnp.zeros((1, D), jnp.float32) * scale,
        wk=trunc_normal(kk, (D, D), std).astype(jnp.bfloat16),
        bk=jnp.zeros((1, D), jnp.float32),
        wv=trunc_normal(kv, (D, D), std).astype(jnp.bfloat16),
        bv=jnp.zeros((1, D), jnp.float32),
        wo=trunc_normal(ko, (D, D), std).astype(jnp.bfloat16),
        bo=jnp.zeros((1, D), jnp.float32),
        post_gamma=jnp.ones((1, D), jnp.float32),
        post_beta=jnp.zeros((1, D), jnp.float32),
    )


def init_ffn(key, D, I, layer_idx):
    std = math.sqrt(2.0 / (5.0 * D))
    k1, k2 = jax.random.split(key)
    s = math.sqrt(1.0 / (2.0 * (1 + layer_idx)))   # Decoder.__init__ per-layer rescale
    w1 = trunc_normal(k1, (D, 2 * I), std) * s
    return dict(
        w1a=w1[:, :I].astype(jnp.bfloat16),        # value half
        w1b=w1[:, I:].astype(jnp.bfloat16),        # gate half
        w2=(trunc_normal(k2, (I, D), std) * s).astype(jnp.bfloat16),
    )


def init_rel_emb(key, D, bucket):
    std = math.sqrt(2.0 / (5.0 * D))
    return dict(
        table=trunc_normal(key, (2 * bucket - 1, D), std),
        gamma=jnp.ones((1, D), jnp.float32),
        beta=jnp.zeros((1, D), jnp.float32),
    )


def init_decoder(key, cfg):
    D, I, L = cfg['hidden_size'], cfg['intermediate_size'], cfg['num_hidden_layers']
    H = cfg['num_attention_heads']
    scale = 1.0 / math.sqrt(3 * (D // H))
    keys = jax.random.split(key, 2 + 3 * L)
    params = dict(
        self_rel=init_rel_emb(keys[0], D, cfg['position_bucket_size']),
        cross_rel=init_rel_emb(keys[1], D, cfg['position_bucket_size']),
        layers=[],
    )
    for i in range(L):
        params['layers'].append(dict(
            self_attn=init_attention(keys[2 + 3 * i], D, scale),
            cross_attn=init_attention(keys[3 + 3 * i], D, scale),
            ffn=init_ffn(keys[4 + 3 * i], D, I, i),
        ))
    return params


# ---------------------------------------------------------------------------
# Forward (hot paths in Pallas; tiny bucket-table math + gather in XLA glue)
# ---------------------------------------------------------------------------

def attention_block(p, qn, kvn, res, mask_add, rel_emb, pos_idx, B, Tq, Tk, H, hs, eps):
    """One Attention module (pre-LN already applied to qn/kvn).  qn: (B*Tq, D) bf16,
    kvn: (B*Tk, D) bf16, res: (B*Tq, D) f32 residual stream.  Returns updated residual."""
    D = H * hs
    R = rel_emb.shape[0]

    q = matmul_bias(qn, p['wq'], p['bq'])      # (B*Tq, D) bf16, scale pre-folded into wq/bq
    k = matmul_bias(kvn, p['wk'], p['bk'])     # (B*Tk, D) bf16
    v = matmul_bias(kvn, p['wv'], p['bv'])     # (B*Tk, D) bf16

    # DeBERTa-style relative position bias: project the tiny (R, D) bucket table, matmul
    # content against it, gather along bucket indices; mask folded in; stored bf16.
    # TODO(synk): move the bucket gather + mask fully in-kernel once Mosaic per-row lane
    # gather is available, to avoid the (B,H,Tq,Tk) bf16 HBM round-trip entirely.
    posq = jnp.dot(rel_emb, p['wq']) + p['bq']         # (R, D), carries the softmax scale
    posk = jnp.dot(rel_emb, p['wk']) + p['bk']         # (R, D)
    q4 = q.reshape(B, Tq, H, hs).astype(jnp.float32)
    k4 = k.reshape(B, Tk, H, hs).astype(jnp.float32)
    c2p = jnp.einsum('bqhd,rhd->bhqr', q4, posk.reshape(R, H, hs))   # (B,H,Tq,R)
    p2c = jnp.einsum('bkhd,rhd->bhkr', k4, posq.reshape(R, H, hs))   # (B,H,Tk,R)
    idx = jnp.broadcast_to(pos_idx[None, None], (B, H, Tq, Tk))
    bias = jnp.take_along_axis(c2p, idx, axis=-1)                    # (B,H,Tq,Tk)
    idx_t = jnp.broadcast_to(pos_idx.T[None, None], (B, H, Tk, Tq))
    bias = bias + jnp.swapaxes(jnp.take_along_axis(p2c, idx_t, axis=-1), -1, -2)
    bias = (bias + mask_add).astype(jnp.bfloat16)

    ctx = attention_core(q.reshape(B, Tq, D), k.reshape(B, Tk, D), v.reshape(B, Tk, D),
                         bias, heads=H, hs=hs)                       # (B,Tq,D) bf16
    # out_proj + post-LN(affine) + residual, fused
    return matmul_ln_res(ctx.reshape(B * Tq, D), p['wo'], p['bo'],
                         p['post_gamma'], p['post_beta'], res, eps)


def decoder_forward(params, x, encoder_output, encoder_padding_mask, cfg):
    T, B, D = x.shape
    S = encoder_output.shape[0]
    H = cfg['num_attention_heads']
    hs = D // H
    eps = cfg['layer_norm_eps']

    # One transpose into (B*T, D) row layout (instead of per-layer head transposes).
    x_bt = x.transpose(1, 0, 2).reshape(B * T, D)
    enc_bt = encoder_output.transpose(1, 0, 2).reshape(B * S, D)

    # RelativeEmbedding.forward: affine LN of the tiny (2K-1, D) table (XLA glue, O(R*D)).
    def rel_ln(p):
        t = p['table']
        mu = jnp.mean(t, axis=-1, keepdims=True)
        tc = t - mu
        var = jnp.mean(tc * tc, axis=-1, keepdims=True)
        return tc * jax.lax.rsqrt(var + eps) * p['gamma'] + p['beta']

    self_rel = rel_ln(params['self_rel'])
    cross_rel = rel_ln(params['cross_rel'])

    pos_idx = build_position_indices(cfg)
    pos_self = pos_idx[:T, :T]
    pos_cross = pos_idx[:T, :S]

    # Additive masks folded into the position-bias tensor.
    causal_add = jnp.triu(jnp.full((T, T), NEG_INF, jnp.float32), k=1)[None, None]  # (1,1,T,T)
    pad_add = encoder_padding_mask.astype(jnp.float32) * NEG_INF                    # (B,1,1,S)

    # The cross-attention pre-LN has no affine params, so LN(encoder_output) is identical
    # for every layer -> compute once for the whole decoder.
    enc_n = layernorm(enc_bt, eps)

    for layer in params['layers']:
        xn = layernorm(x_bt, eps)
        x_bt = attention_block(layer['self_attn'], xn, xn, x_bt, causal_add,
                               self_rel, pos_self, B, T, T, H, hs, eps)
        xn = layernorm(x_bt, eps)
        x_bt = attention_block(layer['cross_attn'], xn, enc_n, x_bt, pad_add,
                               cross_rel, pos_cross, B, T, S, H, hs, eps)
        xn = layernorm(x_bt, eps)
        y = ffn_in(xn, layer['ffn']['w1a'], layer['ffn']['w1b'], eps)   # LN+W1+GeGLU+LN fused
        x_bt = matmul_res(y, layer['ffn']['w2'], x_bt)                  # W2 + residual fused

    return x_bt.reshape(B, T, D).transpose(1, 0, 2)


# ---------------------------------------------------------------------------

if __name__ == "__main__":
    cfg = dict(
        hidden_size=32,
        num_attention_heads=4,
        intermediate_size=64,
        num_hidden_layers=2,
        position_bucket_size=8,
        max_position_embeddings=16,
        layer_norm_eps=1e-7,
        attention_probs_dropout_prob=0.0,   # eval: dropout is identity
        hidden_dropout_prob=0.0,
    )

    key = jax.random.PRNGKey(0)
    kp, kx, ke = jax.random.split(key, 3)
    params = init_decoder(kp, cfg)

    T, B, D = 8, 2, cfg['hidden_size']   # decoder length, batch, hidden
    S = 8                                # encoder length
    x = jax.random.normal(kx, (T, B, D), dtype=jnp.float32)
    encoder_output = jax.random.normal(ke, (S, B, D), dtype=jnp.float32)
    # boolean padding mask, broadcastable to (B, H, T, S); pad last 2 tokens of batch 1
    encoder_padding_mask = jnp.zeros((B, 1, 1, S), dtype=bool).at[1, 0, 0, -2:].set(True)

    fwd = jax.jit(functools.partial(decoder_forward, cfg=cfg))
    out = fwd(params, x, encoder_output, encoder_padding_mask)
    out = jax.block_until_ready(out)

    assert out.shape == (T, B, D), out.shape
    assert bool(jnp.all(jnp.isfinite(out)))
    print("KERNEL_OK")
</pallas_src>

<mosaic_0001>
module attributes {stable_mosaic.version = 11 : i64} {
  func.func @_layernorm_kernel(%arg0: i32, %arg1: memref<8x32xf32, #tpu.memory_space<vmem>>, %arg2: memref<8x32xbf16, #tpu.memory_space<vmem>>) attributes {dimension_semantics = [#tpu.dimension_semantics<parallel>], iteration_bounds = array<i64: 2>, scalar_prefetch = 0 : i64, scratch_operands = 0 : i64, tpu.core_type = #tpu.core_type<tc>, window_params = [{transform_indices = @transform_0, window_bounds = array<i64: 8, 32>}, {transform_indices = @transform_1, window_bounds = array<i64: 8, 32>}]} {
    %c0 = arith.constant 0 : index
    %c0_0 = arith.constant 0 : index
    %0 = vector.load %arg1[%c0, %c0_0] : memref<8x32xf32, #tpu.memory_space<vmem>>, vector<8x32xf32>
    %cst = arith.constant dense<0.000000e+00> : vector<8xf32>
    %1 = vector.multi_reduction <add>, %0, %cst [1] : vector<8x32xf32> to vector<8xf32>
    %2 = vector.shape_cast %1 : vector<8xf32> to vector<8x1xf32>
    %cst_1 = arith.constant 3.200000e+01 : f32
    %3 = vector.broadcast %cst_1 : f32 to vector<8x1xf32>
    %4 = arith.divf %2, %3 : vector<8x1xf32>
    %5 = vector.broadcast %4 : vector<8x1xf32> to vector<8x32xf32>
    %6 = arith.subf %0, %5 : vector<8x32xf32>
    %7 = arith.mulf %6, %6 : vector<8x32xf32>
    %cst_2 = arith.constant dense<0.000000e+00> : vector<8xf32>
    %8 = vector.multi_reduction <add>, %7, %cst_2 [1] : vector<8x32xf32> to vector<8xf32>
    %9 = vector.shape_cast %8 : vector<8xf32> to vector<8x1xf32>
    %cst_3 = arith.constant 3.200000e+01 : f32
    %10 = vector.broadcast %cst_3 : f32 to vector<8x1xf32>
    %11 = arith.divf %9, %10 : vector<8x1xf32>
    %cst_4 = arith.constant 1.000000e-07 : f32
    %12 = vector.broadcast %cst_4 : f32 to vector<8x1xf32>
    %13 = arith.addf %11, %12 : vector<8x1xf32>
    %14 = math.rsqrt %13 : vector<8x1xf32>
    %15 = vector.broadcast %14 : vector<8x1xf32> to vector<8x32xf32>
    %16 = arith.mulf %6, %15 : vector<8x32xf32>
    %17 = arith.truncf %16 : vector<8x32xf32> to vector<8x32xbf16>
    %c0_5 = arith.constant 0 : index
    %c0_6 = arith.constant 0 : index
    %18 = vector.load %arg2[%c0_5, %c0_6] : memref<8x32xbf16, #tpu.memory_space<vmem>>, vector<8x32xbf16>
    tpu.vector_store %arg2[%c0_5, %c0_6], %17 {strides = array<i32>} : memref<8x32xbf16, #tpu.memory_space<vmem>>, vector<8x32xbf16>,
    return
  }
  func.func @transform_0(%arg0: i32) -> (i32, i32) {
    %c0_i32 = arith.constant 0 : i32
    %c0_i32_0 = arith.constant 0 : i32
    return %arg0, %c0_i32 : i32, i32
  }
  func.func @transform_1(%arg0: i32) -> (i32, i32) {
    %c0_i32 = arith.constant 0 : i32
    %c0_i32_0 = arith.constant 0 : i32
    return %arg0, %c0_i32 : i32, i32
  }
}

module attributes {stable_mosaic.version = 11 : i64} {
  func.func @_matmul_bias_kernel(%arg0: i32, %arg1: i32, %arg2: i32, %arg3: memref<8x32xbf16, #tpu.memory_space<vmem>>, %arg4: memref<32x32xbf16, #tpu.memory_space<vmem>>, %arg5: memref<1x32xf32, #tpu.memory_space<vmem>>, %arg6: memref<8x32xbf16, #tpu.memory_space<vmem>>, %arg7: memref<8x32xf32, #tpu.memory_space<vmem>>) attributes {dimension_semantics = [#tpu.dimension_semantics<parallel>, #tpu.dimension_semantics<parallel>, #tpu.dimension_semantics<arbitrary>], iteration_bounds = array<i64: 2, 1, 1>, scalar_prefetch = 0 : i64, scratch_operands = 1 : i64, tpu.core_type = #tpu.core_type<tc>, window_params = [{transform_indices = @transform_0, window_bounds = array<i64: 8, 32>}, {transform_indices = @transform_1, window_bounds = array<i64: 32, 32>}, {transform_indices = @transform_2, window_bounds = array<i64: 1, 32>}, {transform_indices = @transform_3, window_bounds = array<i64: 8, 32>}]} {
    %c0_i32 = arith.constant 0 : i32
    %0 = arith.cmpi eq, %arg2, %c0_i32 : i32
    %1 = arith.extui %0 : i1 to i32
    %c0_i32_0 = arith.constant 0 : i32
    %2 = arith.cmpi ne, %1, %c0_i32_0 : i32
    scf.if %2 {
      %cst_10 = arith.constant 0.000000e+00 : f32
      %12 = vector.broadcast %cst_10 : f32 to vector<8x32xf32>
      %c0_11 = arith.constant 0 : index
      %c0_12 = arith.constant 0 : index
      %13 = vector.load %arg7[%c0_11, %c0_12] : memref<8x32xf32, #tpu.memory_space<vmem>>, vector<8x32xf32>
      tpu.vector_store %arg7[%c0_11, %c0_12], %12 {strides = array<i32>} : memref<8x32xf32, #tpu.memory_space<vmem>>, vector<8x32xf32>,
    } else {
    }
    %c0 = arith.constant 0 : index
    %c0_1 = arith.constant 0 : index
    %3 = vector.load %arg7[%c0, %c0_1] : memref<8x32xf32, #tpu.memory_space<vmem>>, vector<8x32xf32>
    %c0_2 = arith.constant 0 : index
    %c0_3 = arith.constant 0 : index
    %4 = vector.load %arg3[%c0_2, %c0_3] : memref<8x32xbf16, #tpu.memory_space<vmem>>, vector<8x32xbf16>
    %c0_4 = arith.constant 0 : index
    %c0_5 = arith.constant 0 : index
    %5 = vector.load %arg4[%c0_4, %c0_5] : memref<32x32xbf16, #tpu.memory_space<vmem>>, vector<32x32xbf16>
    %cst = arith.constant dense<0.000000e+00> : vector<8x32xf32>
    %6 = tpu.matmul %4, %5, %cst {dimension_numbers = #tpu.dot_dimension_numbers<[1], [0], [0], [1], [0, 0, 1, 1], [], []>} : vector<8x32xbf16>, vector<32x32xbf16>, vector<8x32xf32> -> vector<8x32xf32>
    %7 = arith.addf %3, %6 : vector<8x32xf32>
    %c0_6 = arith.constant 0 : index
    %c0_7 = arith.constant 0 : index
    %8 = vector.load %arg7[%c0_6, %c0_7] : memref<8x32xf32, #tpu.memory_space<vmem>>, vector<8x32xf32>
    tpu.vector_store %arg7[%c0_6, %c0_7], %7 {strides = array<i32>} : memref<8x32xf32, #tpu.memory_space<vmem>>, vector<8x32xf32>,
    %c0_i32_8 = arith.constant 0 : i32
    %9 = arith.cmpi eq, %arg2, %c0_i32_8 : i32
    %10 = arith.extui %9 : i1 to i32
    %c0_i32_9 = arith.constant 0 : i32
    %11 = arith.cmpi ne, %10, %c0_i32_9 : i32
    scf.if %11 {
      %c0_10 = arith.constant 0 : index
      %c0_11 = arith.constant 0 : index
      %12 = vector.load %arg7[%c0_10, %c0_11] : memref<8x32xf32, #tpu.memory_space<vmem>>, vector<8x32xf32>
      %c0_12 = arith.constant 0 : index
      %c0_13 = arith.constant 0 : index
      %13 = vector.load %arg5[%c0_12, %c0_13] : memref<1x32xf32, #tpu.memory_space<vmem>>, vector<1x32xf32>
      %14 = vector.broadcast %13 : vector<1x32xf32> to vector<8x32xf32>
      %15 = arith.addf %12, %14 : vector<8x32xf32>
      %16 = arith.truncf %15 : vector<8x32xf32> to vector<8x32xbf16>
      %c0_14 = arith.constant 0 : index
      %c0_15 = arith.constant 0 : index
      %17 = vector.load %arg6[%c0_14, %c0_15] : memref<8x32xbf16, #tpu.memory_space<vmem>>, vector<8x32xbf16>
      tpu.vector_store %arg6[%c0_14, %c0_15], %16 {strides = array<i32>} : memref<8x32xbf16, #tpu.memory_space<vmem>>, vector<8x32xbf16>,
    } else {
    }
    return
  }
  func.func @transform_0(%arg0: i32, %arg1: i32, %arg2: i32) -> (i32, i32) {
    %c0_i32 = arith.constant 0 : i32
    return %arg0, %arg2 : i32, i32
  }
  func.func @transform_1(%arg0: i32, %arg1: i32, %arg2: i32) -> (i32, i32) {
    %c0_i32 = arith.constant 0 : i32
    return %arg2, %arg1 : i32, i32
  }
  func.func @transform_2(%arg0: i32, %arg1: i32, %arg2: i32) -> (i32, i32) {
    %c0_i32 = arith.constant 0 : i32
    %c0_i32_0 = arith.constant 0 : i32
    return %c0_i32, %arg1 : i32, i32
  }
  func.func @transform_3(%arg0: i32, %arg1: i32, %arg2: i32) -> (i32, i32) {
    %c0_i32 = arith.constant 0 : i32
    return %arg0, %arg1 : i32, i32
  }
}

module attributes {stable_mosaic.version = 11 : i64} {
  func.func @_attn_kernel(%arg0: i32, %arg1: i32, %arg2: i32, %arg3: memref<1x8x32xbf16, #tpu.memory_space<vmem>>, %arg4: memref<1x8x32xbf16, #tpu.memory_space<vmem>>, %arg5: memref<1x8x32xbf16, #tpu.memory_space<vmem>>, %arg6: memref<1x4x8x8xbf16, #tpu.memory_space<vmem>>, %arg7: memref<1x8x32xbf16, #tpu.memory_space<vmem>>, %arg8: memref<4x8x1xf32, #tpu.memory_space<vmem>>, %arg9: memref<4x8x1xf32, #tpu.memory_space<vmem>>, %arg10: memref<4x8x8xf32, #tpu.memory_space<vmem>>) attributes {dimension_semantics = [#tpu.dimension_semantics<parallel>, #tpu.dimension_semantics<parallel>, #tpu.dimension_semantics<arbitrary>], iteration_bounds = array<i64: 2, 1, 1>, scalar_prefetch = 0 : i64, scratch_operands = 3 : i64, tpu.core_type = #tpu.core_type<tc>, window_params = [{transform_indices = @transform_0, window_bounds = array<i64: 1, 8, 32>}, {transform_indices = @transform_1, window_bounds = array<i64: 1, 8, 32>}, {transform_indices = @transform_2, window_bounds = array<i64: 1, 8, 32>}, {transform_indices = @transform_3, window_bounds = array<i64: 1, 4, 8, 8>}, {transform_indices = @transform_4, window_bounds = array<i64: 1, 8, 32>}]} {
    %c0_i32 = arith.constant 0 : i32
    %0 = arith.cmpi eq, %arg2, %c0_i32 : i32
    %1 = arith.extui %0 : i1 to i32
    %c0_i32_0 = arith.constant 0 : i32
    %2 = arith.cmpi ne, %1, %c0_i32_0 : i32
    scf.if %2 {
      %cst_111 = arith.constant 0xFF800000 : f32
      %172 = vector.broadcast %cst_111 : f32 to vector<4x8x1xf32>
      %c0_112 = arith.constant 0 : index
      %c0_113 = arith.constant 0 : index
      %c0_114 = arith.constant 0 : index
      %173 = vector.load %arg8[%c0_112, %c0_113, %c0_114] : memref<4x8x1xf32, #tpu.memory_space<vmem>>, vector<4x8x1xf32>
      tpu.vector_store %arg8[%c0_112, %c0_113, %c0_114], %172 {strides = array<i32>} : memref<4x8x1xf32, #tpu.memory_space<vmem>>, vector<4x8x1xf32>,
      %cst_115 = arith.constant 0.000000e+00 : f32
      %174 = vector.broadcast %cst_115 : f32 to vector<4x8x1xf32>
      %c0_116 = arith.constant 0 : index
      %c0_117 = arith.constant 0 : index
      %c0_118 = arith.constant 0 : index
      %175 = vector.load %arg9[%c0_116, %c0_117, %c0_118] : memref<4x8x1xf32, #tpu.memory_space<vmem>>, vector<4x8x1xf32>
      tpu.vector_store %arg9[%c0_116, %c0_117, %c0_118], %174 {strides = array<i32>} : memref<4x8x1xf32, #tpu.memory_space<vmem>>, vector<4x8x1xf32>,
      %cst_119 = arith.constant 0.000000e+00 : f32
      %176 = vector.broadcast %cst_119 : f32 to vector<4x8x8xf32>
      %c0_120 = arith.constant 0 : index
      %c0_121 = arith.constant 0 : index
      %c0_122 = arith.constant 0 : index
      %177 = vector.load %arg10[%c0_120, %c0_121, %c0_122] : memref<4x8x8xf32, #tpu.memory_space<vmem>>, vector<4x8x8xf32>
      tpu.vector_store %arg10[%c0_120, %c0_121, %c0_122], %176 {strides = array<i32>} : memref<4x8x8xf32, #tpu.memory_space<vmem>>, vector<4x8x8xf32>,
    } else {
    }
    %c0 = arith.constant 0 : index
    %c0_1 = arith.constant 0 : index
    %c0_2 = arith.constant 0 : index
    %3 = vector.load %arg3[%c0, %c0_1, %c0_2] : memref<1x8x32xbf16, #tpu.memory_space<vmem>>, vector<1x8x32xbf16>
    %4 = vector.shape_cast %3 : vector<1x8x32xbf16> to vector<8x32xbf16>
    %c0_3 = arith.constant 0 : index
    %c0_4 = arith.constant 0 : index
    %c0_5 = arith.constant 0 : index
    %5 = vector.load %arg4[%c0_3, %c0_4, %c0_5] : memref<1x8x32xbf16, #tpu.memory_space<vmem>>, vector<1x8x32xbf16>
    %6 = vector.shape_cast %5 : vector<1x8x32xbf16> to vector<8x32xbf16>
    %c0_6 = arith.constant 0 : index
    %c0_7 = arith.constant 0 : index
    %c0_8 = arith.constant 0 : index
    %7 = vector.load %arg5[%c0_6, %c0_7, %c0_8] : memref<1x8x32xbf16, #tpu.memory_space<vmem>>, vector<1x8x32xbf16>
    %8 = vector.shape_cast %7 : vector<1x8x32xbf16> to vector<8x32xbf16>
    %9 = vector.extract_strided_slice %4 {offsets = [0, 0], sizes = [8, 8], strides = [1, 1]} : vector<8x32xbf16> to vector<8x8xbf16>
    %10 = vector.extract_strided_slice %6 {offsets = [0, 0], sizes = [8, 8], strides = [1, 1]} : vector<8x32xbf16> to vector<8x8xbf16>
    %11 = vector.extract_strided_slice %8 {offsets = [0, 0], sizes = [8, 8], strides = [1, 1]} : vector<8x32xbf16> to vector<8x8xbf16>
    %cst = arith.constant dense<0.000000e+00> : vector<8x8xf32>
    %12 = tpu.matmul %9, %10, %cst {dimension_numbers = #tpu.dot_dimension_numbers<[1], [1], [0], [0], [0, 0, 1, 0], [], []>} : vector<8x8xbf16>, vector<8x8xbf16>, vector<8x8xf32> -> vector<8x8xf32>
    %c0_9 = arith.constant 0 : index
    %c0_10 = arith.constant 0 : index
    %c0_11 = arith.constant 0 : index
    %c0_12 = arith.constant 0 : index
    %13 = vector.load %arg6[%c0_9, %c0_10, %c0_11, %c0_12] : memref<1x4x8x8xbf16, #tpu.memory_space<vmem>>, vector<1x1x8x8xbf16>
    %14 = vector.shape_cast %13 : vector<1x1x8x8xbf16> to vector<8x8xbf16>
    %15 = arith.extf %14 : vector<8x8xbf16> to vector<8x8xf32>
    %16 = arith.addf %12, %15 : vector<8x8xf32>
    %c0_13 = arith.constant 0 : index
    %c0_14 = arith.constant 0 : index
    %c0_15 = arith.constant 0 : index
    %17 = vector.load %arg8[%c0_13, %c0_14, %c0_15] : memref<4x8x1xf32, #tpu.memory_space<vmem>>, vector<1x8x1xf32>
    %18 = vector.shape_cast %17 : vector<1x8x1xf32> to vector<8x1xf32>
    %cst_16 = arith.constant dense<0xFF800000> : vector<8xf32>
    %19 = vector.multi_reduction <maximumf>, %16, %cst_16 [1] : vector<8x8xf32> to vector<8xf32>
    %20 = vector.shape_cast %19 : vector<8xf32> to vector<8x1xf32>
    %21 = arith.maximumf %18, %20 : vector<8x1xf32>
    %22 = arith.subf %18, %21 : vector<8x1xf32>
    %23 = math.exp %22 : vector<8x1xf32>
    %24 = vector.broadcast %21 : vector<8x1xf32> to vector<8x8xf32>
    %25 = arith.subf %16, %24 : vector<8x8xf32>
    %26 = math.exp %25 : vector<8x8xf32>
    %c0_17 = arith.constant 0 : index
    %c0_18 = arith.constant 0 : index
    %c0_19 = arith.constant 0 : index
    %27 = vector.load %arg9[%c0_17, %c0_18, %c0_19] : memref<4x8x1xf32, #tpu.memory_space<vmem>>, vector<1x8x1xf32>
    %28 = vector.shape_cast %27 : vector<1x8x1xf32> to vector<8x1xf32>
    %29 = arith.mulf %23, %28 : vector<8x1xf32>
    %cst_20 = arith.constant dense<0.000000e+00> : vector<8xf32>
    %30 = vector.multi_reduction <add>, %26, %cst_20 [1] : vector<8x8xf32> to vector<8xf32>
    %31 = vector.shape_cast %30 : vector<8xf32> to vector<8x1xf32>
    %32 = arith.addf %29, %31 : vector<8x1xf32>
    %c0_21 = arith.constant 0 : index
    %c0_22 = arith.constant 0 : index
    %c0_23 = arith.constant 0 : index
    %33 = vector.load %arg9[%c0_21, %c0_22, %c0_23] : memref<4x8x1xf32, #tpu.memory_space<vmem>>, vector<1x8x1xf32>
    %34 = vector.shape_cast %33 : vector<1x8x1xf32> to vector<8x1xf32>
    %35 = vector.shape_cast %32 : vector<8x1xf32> to vector<1x8x1xf32>
    tpu.vector_store %arg9[%c0_21, %c0_22, %c0_23], %35 {strides = array<i32>} : memref<4x8x1xf32, #tpu.memory_space<vmem>>, vector<1x8x1xf32>,
    %c0_24 = arith.constant 0 : index
    %c0_25 = arith.constant 0 : index
    %c0_26 = arith.constant 0 : index
    %36 = vector.load %arg10[%c0_24, %c0_25, %c0_26] : memref<4x8x8xf32, #tpu.memory_space<vmem>>, vector<1x8x8xf32>
    %37 = vector.shape_cast %36 : vector<1x8x8xf32> to vector<8x8xf32>
    %38 = vector.broadcast %23 : vector<8x1xf32> to vector<8x8xf32>
    %39 = arith.mulf %38, %37 : vector<8x8xf32>
    %40 = arith.truncf %26 : vector<8x8xf32> to vector<8x8xbf16>
    %cst_27 = arith.constant dense<0.000000e+00> : vector<8x8xf32>
    %41 = tpu.matmul %40, %11, %cst_27 {dimension_numbers = #tpu.dot_dimension_numbers<[1], [0], [0], [1], [0, 0, 1, 1], [], []>} : vector<8x8xbf16>, vector<8x8xbf16>, vector<8x8xf32> -> vector<8x8xf32>
    %42 = arith.addf %39, %41 : vector<8x8xf32>
    %c0_28 = arith.constant 0 : index
    %c0_29 = arith.constant 0 : index
    %c0_30 = arith.constant 0 : index
    %43 = vector.load %arg10[%c0_28, %c0_29, %c0_30] : memref<4x8x8xf32, #tpu.memory_space<vmem>>, vector<1x8x8xf32>
    %44 = vector.shape_cast %43 : vector<1x8x8xf32> to vector<8x8xf32>
    %45 = vector.shape_cast %42 : vector<8x8xf32> to vector<1x8x8xf32>
    tpu.vector_store %arg10[%c0_28, %c0_29, %c0_30], %45 {strides = array<i32>} : memref<4x8x8xf32, #tpu.memory_space<vmem>>, vector<1x8x8xf32>,
    %c0_31 = arith.constant 0 : index
    %c0_32 = arith.constant 0 : index
    %c0_33 = arith.constant 0 : index
    %46 = vector.load %arg8[%c0_31, %c0_32, %c0_33] : memref<4x8x1xf32, #tpu.memory_space<vmem>>, vector<1x8x1xf32>
    %47 = vector.shape_cast %46 : vector<1x8x1xf32> to vector<8x1xf32>
    %48 = vector.shape_cast %21 : vector<8x1xf32> to vector<1x8x1xf32>
    tpu.vector_store %arg8[%c0_31, %c0_32, %c0_33], %48 {strides = array<i32>} : memref<4x8x1xf32, #tpu.memory_space<vmem>>, vector<1x8x1xf32>,
    %49 = vector.extract_strided_slice %4 {offsets = [0, 8], sizes = [8, 8], strides = [1, 1]} : vector<8x32xbf16> to vector<8x8xbf16>
    %50 = vector.extract_strided_slice %6 {offsets = [0, 8], sizes = [8, 8], strides = [1, 1]} : vector<8x32xbf16> to vector<8x8xbf16>
    %51 = vector.extract_strided_slice %8 {offsets = [0, 8], sizes = [8, 8], strides = [1, 1]} : vector<8x32xbf16> to vector<8x8xbf16>
    %cst_34 = arith.constant dense<0.000000e+00> : vector<8x8xf32>
    %52 = tpu.matmul %49, %50, %cst_34 {dimension_numbers = #tpu.dot_dimension_numbers<[1], [1], [0], [0], [0, 0, 1, 0], [], []>} : vector<8x8xbf16>, vector<8x8xbf16>, vector<8x8xf32> -> vector<8x8xf32>
    %c0_35 = arith.constant 0 : index
    %c1 = arith.constant 1 : index
    %c0_36 = arith.constant 0 : index
    %c0_37 = arith.constant 0 : index
    %53 = vector.load %arg6[%c0_35, %c1, %c0_36, %c0_37] : memref<1x4x8x8xbf16, #tpu.memory_space<vmem>>, vector<1x1x8x8xbf16>
    %54 = vector.shape_cast %53 : vector<1x1x8x8xbf16> to vector<8x8xbf16>
    %55 = arith.extf %54 : vector<8x8xbf16> to vector<8x8xf32>
    %56 = arith.addf %52, %55 : vector<8x8xf32>
    %c1_38 = arith.constant 1 : index
    %c0_39 = arith.constant 0 : index
    %c0_40 = arith.constant 0 : index
    %57 = vector.load %arg8[%c1_38, %c0_39, %c0_40] : memref<4x8x1xf32, #tpu.memory_space<vmem>>, vector<1x8x1xf32>
    %58 = vector.shape_cast %57 : vector<1x8x1xf32> to vector<8x1xf32>
    %cst_41 = arith.constant dense<0xFF800000> : vector<8xf32>
    %59 = vector.multi_reduction <maximumf>, %56, %cst_41 [1] : vector<8x8xf32> to vector<8xf32>
    %60 = vector.shape_cast %59 : vector<8xf32> to vector<8x1xf32>
    %61 = arith.maximumf %58, %60 : vector<8x1xf32>
    %62 = arith.subf %58, %61 : vector<8x1xf32>
    %63 = math.exp %62 : vector<8x1xf32>
    %64 = vector.broadcast %61 : vector<8x1xf32> to vector<8x8xf32>
    %65 = arith.subf %56, %64 : vector<8x8xf32>
    %66 = math.exp %65 : vector<8x8xf32>
    %c1_42 = arith.constant 1 : index
    %c0_43 = arith.constant 0 : index
    %c0_44 = arith.constant 0 : index
    %67 = vector.load %arg9[%c1_42, %c0_43, %c0_44] : memref<4x8x1xf32, #tpu.memory_space<vmem>>, vector<1x8x1xf32>
    %68 = vector.shape_cast %67 : vector<1x8x1xf32> to vector<8x1xf32>
    %69 = arith.mulf %63, %68 : vector<8x1xf32>
    %cst_45 = arith.constant dense<0.000000e+00> : vector<8xf32>
    %70 = vector.multi_reduction <add>, %66, %cst_45 [1] : vector<8x8xf32> to vector<8xf32>
    %71 = vector.shape_cast %70 : vector<8xf32> to vector<8x1xf32>
    %72 = arith.addf %69, %71 : vector<8x1xf32>
    %c1_46 = arith.constant 1 : index
    %c0_47 = arith.constant 0 : index
    %c0_48 = arith.constant 0 : index
    %73 = vector.load %arg9[%c1_46, %c0_47, %c0_48] : memref<4x8x1xf32, #tpu.memory_space<vmem>>, vector<1x8x1xf32>
    %74 = vector.shape_cast %73 : vector<1x8x1xf32> to vector<8x1xf32>
    %75 = vector.shape_cast %72 : vector<8x1xf32> to vector<1x8x1xf32>
    tpu.vector_store %arg9[%c1_46, %c0_47, %c0_48], %75 {strides = array<i32>} : memref<4x8x1xf32, #tpu.memory_space<vmem>>, vector<1x8x1xf32>,
    %c1_49 = arith.constant 1 : index
    %c0_50 = arith.constant 0 : index
    %c0_51 = arith.constant 0 : index
    %76 = vector.load %arg10[%c1_49, %c0_50, %c0_51] : memref<4x8x8xf32, #tpu.memory_space<vmem>>, vector<1x8x8xf32>
    %77 = vector.shape_cast %76 : vector<1x8x8xf32> to vector<8x8xf32>
    %78 = vector.broadcast %63 : vector<8x1xf32> to vector<8x8xf32>
    %79 = arith.mulf %78, %77 : vector<8x8xf32>
    %80 = arith.truncf %66 : vector<8x8xf32> to vector<8x8xbf16>
    %cst_52 = arith.constant dense<0.000000e+00> : vector<8x8xf32>
    %81 = tpu.matmul %80, %51, %cst_52 {dimension_numbers = #tpu.dot_dimension_numbers<[1], [0], [0], [1], [0, 0, 1, 1], [], []>} : vector<8x8xbf16>, vector<8x8xbf16>, vector<8x8xf32> -> vector<8x8xf32>
    %82 = arith.addf %79, %81 : vector<8x8xf32>
    %c1_53 = arith.constant 1 : index
    %c0_54 = arith.constant 0 : index
    %c0_55 = arith.constant 0 : index
    %83 = vector.load %arg10[%c1_53, %c0_54, %c0_55] : memref<4x8x8xf32, #tpu.memory_space<vmem>>, vector<1x8x8xf32>
    %84 = vector.shape_cast %83 : vector<1x8x8xf32> to vector<8x8xf32>
    %85 = vector.shape_cast %82 : vector<8x8xf32> to vector<1x8x8xf32>
    tpu.vector_store %arg10[%c1_53, %c0_54, %c0_55], %85 {strides = array<i32>} : memref<4x8x8xf32, #tpu.memory_space<vmem>>, vector<1x8x8xf32>,
    %c1_56 = arith.constant 1 : index
    %c0_57 = arith.constant 0 : index
    %c0_58 = arith.constant 0 : index
    %86 = vector.load %arg8[%c1_56, %c0_57, %c0_58] : memref<4x8x1xf32, #tpu.memory_space<vmem>>, vector<1x8x1xf32>
    %87 = vector.shape_cast %86 : vector<1x8x1xf32> to vector<8x1xf32>
    %88 = vector.shape_cast %61 : vector<8x1xf32> to vector<1x8x1xf32>
    tpu.vector_store %arg8[%c1_56, %c0_57, %c0_58], %88 {strides = array<i32>} : memref<4x8x1xf32, #tpu.memory_space<vmem>>, vector<1x8x1xf32>,
    %89 = vector.extract_strided_slice %4 {offsets = [0, 16], sizes = [8, 8], strides = [1, 1]} : vector<8x32xbf16> to vector<8x8xbf16>
    %90 = vector.extract_strided_slice %6 {offsets = [0, 16], sizes = [8, 8], strides = [1, 1]} : vector<8x32xbf16> to vector<8x8xbf16>
    %91 = vector.extract_strided_slice %8 {offsets = [0, 16], sizes = [8, 8], strides = [1, 1]} : vector<8x32xbf16> to vector<8x8xbf16>
    %cst_59 = arith.constant dense<0.000000e+00> : vector<8x8xf32>
    %92 = tpu.matmul %89, %90, %cst_59 {dimension_numbers = #tpu.dot_dimension_numbers<[1], [1], [0], [0], [0, 0, 1, 0], [], []>} : vector<8x8xbf16>, vector<8x8xbf16>, vector<8x8xf32> -> vector<8x8xf32>
    %c0_60 = arith.constant 0 : index
    %c2 = arith.constant 2 : index
    %c0_61 = arith.constant 0 : index
    %c0_62 = arith.constant 0 : index
    %93 = vector.load %arg6[%c0_60, %c2, %c0_61, %c0_62] : memref<1x4x8x8xbf16, #tpu.memory_space<vmem>>, vector<1x1x8x8xbf16>
    %94 = vector.shape_cast %93 : vector<1x1x8x8xbf16> to vector<8x8xbf16>
    %95 = arith.extf %94 : vector<8x8xbf16> to vector<8x8xf32>
    %96 = arith.addf %92, %95 : vector<8x8xf32>
    %c2_63 = arith.constant 2 : index
    %c0_64 = arith.constant 0 : index
    %c0_65 = arith.constant 0 : index
    %97 = vector.load %arg8[%c2_63, %c0_64, %c0_65] : memref<4x8x1xf32, #tpu.memory_space<vmem>>, vector<1x8x1xf32>
    %98 = vector.shape_cast %97 : vector<1x8x1xf32> to vector<8x1xf32>
    %cst_66 = arith.constant dense<0xFF800000> : vector<8xf32>
    %99 = vector.multi_reduction <maximumf>, %96, %cst_66 [1] : vector<8x8xf32> to vector<8xf32>
    %100 = vector.shape_cast %99 : vector<8xf32> to vector<8x1xf32>
    %101 = arith.maximumf %98, %100 : vector<8x1xf32>
    %102 = arith.subf %98, %101 : vector<8x1xf32>
    %103 = math.exp %102 : vector<8x1xf32>
    %104 = vector.broadcast %101 : vector<8x1xf32> to vector<8x8xf32>
    %105 = arith.subf %96, %104 : vector<8x8xf32>
    %106 = math.exp %105 : vector<8x8xf32>
    %c2_67 = arith.constant 2 : index
    %c0_68 = arith.constant 0 : index
    %c0_69 = arith.constant 0 : index
    %107 = vector.load %arg9[%c2_67, %c0_68, %c0_69] : memref<4x8x1xf32, #tpu.memory_space<vmem>>, vector<1x8x1xf32>
    %108 = vector.shape_cast %107 : vector<1x8x1xf32> to vector<8x1xf32>
    %109 = arith.mulf %103, %108 : vector<8x1xf32>
    %cst_70 = arith.constant dense<0.000000e+00> : vector<8xf32>
    %110 = vector.multi_reduction <add>, %106, %cst_70 [1] : vector<8x8xf32> to vector<8xf32>
    %111 = vector.shape_cast %110 : vector<8xf32> to vector<8x1xf32>
    %112 = arith.addf %109, %111 : vector<8x1xf32>
    %c2_71 = arith.constant 2 : index
    %c0_72 = arith.constant 0 : index
    %c0_73 = arith.constant 0 : index
    %113 = vector.load %arg9[%c2_71, %c0_72, %c0_73] : memref<4x8x1xf32, #tpu.memory_space<vmem>>, vector<1x8x1xf32>
    %114 = vector.shape_cast %113 : vector<1x8x1xf32> to vector<8x1xf32>
    %115 = vector.shape_cast %112 : vector<8x1xf32> to vector<1x8x1xf32>
    tpu.vector_store %arg9[%c2_71, %c0_72, %c0_73], %115 {strides = array<i32>} : memref<4x8x1xf32, #tpu.memory_space<vmem>>, vector<1x8x1xf32>,
    %c2_74 = arith.constant 2 : index
    %c0_75 = arith.constant 0 : index
    %c0_76 = arith.constant 0 : index
    %116 = vector.load %arg10[%c2_74, %c0_75, %c0_76] : memref<4x8x8xf32, #tpu.memory_space<vmem>>, vector<1x8x8xf32>
    %117 = vector.shape_cast %116 : vector<1x8x8xf32> to vector<8x8xf32>
    %118 = vector.broadcast %103 : vector<8x1xf32> to vector<8x8xf32>
    %119 = arith.mulf %118, %117 : vector<8x8xf32>
    %120 = arith.truncf %106 : vector<8x8xf32> to vector<8x8xbf16>
    %cst_77 = arith.constant dense<0.000000e+00> : vector<8x8xf32>
    %121 = tpu.matmul %120, %91, %cst_77 {dimension_numbers = #tpu.dot_dimension_numbers<[1], [0], [0], [1], [0, 0, 1, 1], [], []>} : vector<8x8xbf16>, vector<8x8xbf16>, vector<8x8xf32> -> vector<8x8xf32>
    %122 = arith.addf %119, %121 : vector<8x8xf32>
    %c2_78 = arith.constant 2 : index
    %c0_79 = arith.constant 0 : index
    %c0_80 = arith.constant 0 : index
    %123 = vector.load %arg10[%c2_78, %c0_79, %c0_80] : memref<4x8x8xf32, #tpu.memory_space<vmem>>, vector<1x8x8xf32>
    %124 = vector.shape_cast %123 : vector<1x8x8xf32> to vector<8x8xf32>
    %125 = vector.shape_cast %122 : vector<8x8xf32> to vector<1x8x8xf32>
    tpu.vector_store %arg10[%c2_78, %c0_79, %c0_80], %125 {strides = array<i32>} : memref<4x8x8xf32, #tpu.memory_space<vmem>>, vector<1x8x8xf32>,
    %c2_81 = arith.constant 2 : index
    %c0_82 = arith.constant 0 : index
    %c0_83 = arith.constant 0 : index
    %126 = vector.load %arg8[%c2_81, %c0_82, %c0_83] : memref<4x8x1xf32, #tpu.memory_space<vmem>>, vector<1x8x1xf32>
    %127 = vector.shape_cast %126 : vector<1x8x1xf32> to vector<8x1xf32>
    %128 = vector.shape_cast %101 : vector<8x1xf32> to vector<1x8x1xf32>
    tpu.vector_store %arg8[%c2_81, %c0_82, %c0_83], %128 {strides = array<i32>} : memref<4x8x1xf32, #tpu.memory_space<vmem>>, vector<1x8x1xf32>,
    %129 = vector.extract_strided_slice %4 {offsets = [0, 24], sizes = [8, 8], strides = [1, 1]} : vector<8x32xbf16> to vector<8x8xbf16>
    %130 = vector.extract_strided_slice %6 {offsets = [0, 24], sizes = [8, 8], strides = [1, 1]} : vector<8x32xbf16> to vector<8x8xbf16>
    %131 = vector.extract_strided_slice %8 {offsets = [0, 24], sizes = [8, 8], strides = [1, 1]} : vector<8x32xbf16> to vector<8x8xbf16>
    %cst_84 = arith.constant dense<0.000000e+00> : vector<8x8xf32>
    %132 = tpu.matmul %129, %130, %cst_84 {dimension_numbers = #tpu.dot_dimension_numbers<[1], [1], [0], [0], [0, 0, 1, 0], [], []>} : vector<8x8xbf16>, vector<8x8xbf16>, vector<8x8xf32> -> vector<8x8xf32>
    %c0_85 = arith.constant 0 : index
    %c3 = arith.constant 3 : index
    %c0_86 = arith.constant 0 : index
    %c0_87 = arith.constant 0 : index
    %133 = vector.load %arg6[%c0_85, %c3, %c0_86, %c0_87] : memref<1x4x8x8xbf16, #tpu.memory_space<vmem>>, vector<1x1x8x8xbf16>
    %134 = vector.shape_cast %133 : vector<1x1x8x8xbf16> to vector<8x8xbf16>
    %135 = arith.extf %134 : vector<8x8xbf16> to vector<8x8xf32>
    %136 = arith.addf %132, %135 : vector<8x8xf32>
    %c3_88 = arith.constant 3 : index
    %c0_89 = arith.constant 0 : index
    %c0_90 = arith.constant 0 : index
    %137 = vector.load %arg8[%c3_88, %c0_89, %c0_90] : memref<4x8x1xf32, #tpu.memory_space<vmem>>, vector<1x8x1xf32>
    %138 = vector.shape_cast %137 : vector<1x8x1xf32> to vector<8x1xf32>
    %cst_91 = arith.constant dense<0xFF800000> : vector<8xf32>
    %139 = vector.multi_reduction <maximumf>, %136, %cst_91 [1] : vector<8x8xf32> to vector<8xf32>
    %140 = vector.shape_cast %139 : vector<8xf32> to vector<8x1xf32>
    %141 = arith.maximumf %138, %140 : vector<8x1xf32>
    %142 = arith.subf %138, %141 : vector<8x1xf32>
    %143 = math.exp %142 : vector<8x1xf32>
    %144 = vector.broadcast %141 : vector<8x1xf32> to vector<8x8xf32>
    %145 = arith.subf %136, %144 : vector<8x8xf32>
    %146 = math.exp %145 : vector<8x8xf32>
    %c3_92 = arith.constant 3 : index
    %c0_93 = arith.constant 0 : index
    %c0_94 = arith.constant 0 : index
    %147 = vector.load %arg9[%c3_92, %c0_93, %c0_94] : memref<4x8x1xf32, #tpu.memory_space<vmem>>, vector<1x8x1xf32>
    %148 = vector.shape_cast %147 : vector<1x8x1xf32> to vector<8x1xf32>
    %149 = arith.mulf %143, %148 : vector<8x1xf32>
    %cst_95 = arith.constant dense<0.000000e+00> : vector<8xf32>
    %150 = vector.multi_reduction <add>, %146, %cst_95 [1] : vector<8x8xf32> to vector<8xf32>
    %151 = vector.shape_cast %150 : vector<8xf32> to vector<8x1xf32>
    %152 = arith.addf %149, %151 : vector<8x1xf32>
    %c3_96 = arith.constant 3 : index
    %c0_97 = arith.constant 0 : index
    %c0_98 = arith.constant 0 : index
    %153 = vector.load %arg9[%c3_96, %c0_97, %c0_98] : memref<4x8x1xf32, #tpu.memory_space<vmem>>, vector<1x8x1xf32>
    %154 = vector.shape_cast %153 : vector<1x8x1xf32> to vector<8x1xf32>
    %155 = vector.shape_cast %152 : vector<8x1xf32> to vector<1x8x1xf32>
    tpu.vector_store %arg9[%c3_96, %c0_97, %c0_98], %155 {strides = array<i32>} : memref<4x8x1xf32, #tpu.memory_space<vmem>>, vector<1x8x1xf32>,
    %c3_99 = arith.constant 3 : index
    %c0_100 = arith.constant 0 : index
    %c0_101 = arith.constant 0 : index
    %156 = vector.load %arg10[%c3_99, %c0_100, %c0_101] : memref<4x8x8xf32, #tpu.memory_space<vmem>>, vector<1x8x8xf32>
    %157 = vector.shape_cast %156 : vector<1x8x8xf32> to vector<8x8xf32>
    %158 = vector.broadcast %143 : vector<8x1xf32> to vector<8x8xf32>
    %159 = arith.mulf %158, %157 : vector<8x8xf32>
    %160 = arith.truncf %146 : vector<8x8xf32> to vector<8x8xbf16>
    %cst_102 = arith.constant dense<0.000000e+00> : vector<8x8xf32>
    %161 = tpu.matmul %160, %131, %cst_102 {dimension_numbers = #tpu.dot_dimension_numbers<[1], [0], [0], [1], [0, 0, 1, 1], [], []>} : vector<8x8xbf16>, vector<8x8xbf16>, vector<8x8xf32> -> vector<8x8xf32>
    %162 = arith.addf %159, %161 : vector<8x8xf32>
    %c3_103 = arith.constant 3 : index
    %c0_104 = arith.constant 0 : index
    %c0_105 = arith.constant 0 : index
    %163 = vector.load %arg10[%c3_103, %c0_104, %c0_105] : memref<4x8x8xf32, #tpu.memory_space<vmem>>, vector<1x8x8xf32>
    %164 = vector.shape_cast %163 : vector<1x8x8xf32> to vector<8x8xf32>
    %165 = vector.shape_cast %162 : vector<8x8xf32> to vector<1x8x8xf32>
    tpu.vector_store %arg10[%c3_103, %c0_104, %c0_105], %165 {strides = array<i32>} : memref<4x8x8xf32, #tpu.memory_space<vmem>>, vector<1x8x8xf32>,
    %c3_106 = arith.constant 3 : index
    %c0_107 = arith.constant 0 : index
    %c0_108 = arith.constant 0 : index
    %166 = vector.load %arg8[%c3_106, %c0_107, %c0_108] : memref<4x8x1xf32, #tpu.memory_space<vmem>>, vector<1x8x1xf32>
    %167 = vector.shape_cast %166 : vector<1x8x1xf32> to vector<8x1xf32>
    %168 = vector.shape_cast %141 : vector<8x1xf32> to vector<1x8x1xf32>
    tpu.vector_store %arg8[%c3_106, %c0_107, %c0_108], %168 {strides = array<i32>} : memref<4x8x1xf32, #tpu.memory_space<vmem>>, vector<1x8x1xf32>,
    %c0_i32_109 = arith.constant 0 : i32
    %169 = arith.cmpi eq, %arg2, %c0_i32_109 : i32
    %170 = arith.extui %169 : i1 to i32
    %c0_i32_110 = arith.constant 0 : i32
    %171 = arith.cmpi ne, %170, %c0_i32_110 : i32
    scf.if %171 {
      %c0_111 = arith.constant 0 : index
      %c0_112 = arith.constant 0 : index
      %c0_113 = arith.constant 0 : index
      %172 = vector.load %arg9[%c0_111, %c0_112, %c0_113] : memref<4x8x1xf32, #tpu.memory_space<vmem>>, vector<1x8x1xf32>
      %173 = vector.shape_cast %172 : vector<1x8x1xf32> to vector<8x1xf32>
      %174 = tpu.reciprocal %173 : vector<8x1xf32> -> vector<8x1xf32>
      %c0_114 = arith.constant 0 : index
      %c0_115 = arith.constant 0 : index
      %c0_116 = arith.constant 0 : index
      %175 = vector.load %arg10[%c0_114, %c0_115, %c0_116] : memref<4x8x8xf32, #tpu.memory_space<vmem>>, vector<1x8x8xf32>
      %176 = vector.shape_cast %175 : vector<1x8x8xf32> to vector<8x8xf32>
      %177 = vector.broadcast %174 : vector<8x1xf32> to vector<8x8xf32>
      %178 = arith.mulf %176, %177 : vector<8x8xf32>
      %179 = arith.truncf %178 : vector<8x8xf32> to vector<8x8xbf16>
      %c0_117 = arith.constant 0 : index
      %c0_118 = arith.constant 0 : index
      %c0_119 = arith.constant 0 : index
      %180 = vector.load %arg7[%c0_117, %c0_118, %c0_119] : memref<1x8x32xbf16, #tpu.memory_space<vmem>>, vector<1x8x8xbf16>
      %181 = vector.shape_cast %180 : vector<1x8x8xbf16> to vector<8x8xbf16>
      %182 = vector.shape_cast %179 : vector<8x8xbf16> to vector<1x8x8xbf16>
      tpu.vector_store %arg7[%c0_117, %c0_118, %c0_119], %182 {strides = array<i32>} : memref<1x8x32xbf16, #tpu.memory_space<vmem>>, vector<1x8x8xbf16>,
      %c1_120 = arith.constant 1 : index
      %c0_121 = arith.constant 0 : index
      %c0_122 = arith.constant 0 : index
      %183 = vector.load %arg9[%c1_120, %c0_121, %c0_122] : memref<4x8x1xf32, #tpu.memory_space<vmem>>, vector<1x8x1xf32>
      %184 = vector.shape_cast %183 : vector<1x8x1xf32> to vector<8x1xf32>
      %185 = tpu.reciprocal %184 : vector<8x1xf32> -> vector<8x1xf32>
      %c1_123 = arith.constant 1 : index
      %c0_124 = arith.constant 0 : index
      %c0_125 = arith.constant 0 : index
      %186 = vector.load %arg10[%c1_123, %c0_124, %c0_125] : memref<4x8x8xf32, #tpu.memory_space<vmem>>, vector<1x8x8xf32>
      %187 = vector.shape_cast %186 : vector<1x8x8xf32> to vector<8x8xf32>
      %188 = vector.broadcast %185 : vector<8x1xf32> to vector<8x8xf32>
      %189 = arith.mulf %187, %188 : vector<8x8xf32>
      %190 = arith.truncf %189 : vector<8x8xf32> to vector<8x8xbf16>
      %c0_126 = arith.constant 0 : index
      %c0_127 = arith.constant 0 : index
      %c8 = arith.constant 8 : index
      %191 = vector.load %arg7[%c0_126, %c0_127, %c8] : memref<1x8x32xbf16, #tpu.memory_space<vmem>>, vector<1x8x8xbf16>
      %192 = vector.shape_cast %191 : vector<1x8x8xbf16> to vector<8x8xbf16>
      %193 = vector.shape_cast %190 : vector<8x8xbf16> to vector<1x8x8xbf16>
      tpu.vector_store %arg7[%c0_126, %c0_127, %c8], %193 {strides = array<i32>} : memref<1x8x32xbf16, #tpu.memory_space<vmem>>, vector<1x8x8xbf16>,
      %c2_128 = arith.constant 2 : index
      %c0_129 = arith.constant 0 : index
      %c0_130 = arith.constant 0 : index
      %194 = vector.load %arg9[%c2_128, %c0_129, %c0_130] : memref<4x8x1xf32, #tpu.memory_space<vmem>>, vector<1x8x1xf32>
      %195 = vector.shape_cast %194 : vector<1x8x1xf32> to vector<8x1xf32>
      %196 = tpu.reciprocal %195 : vector<8x1xf32> -> vector<8x1xf32>
      %c2_131 = arith.constant 2 : index
      %c0_132 = arith.constant 0 : index
      %c0_133 = arith.constant 0 : index
      %197 = vector.load %arg10[%c2_131, %c0_132, %c0_133] : memref<4x8x8xf32, #tpu.memory_space<vmem>>, vector<1x8x8xf32>
      %198 = vector.shape_cast %197 : vector<1x8x8xf32> to vector<8x8xf32>
      %199 = vector.broadcast %196 : vector<8x1xf32> to vector<8x8xf32>
      %200 = arith.mulf %198, %199 : vector<8x8xf32>
      %201 = arith.truncf %200 : vector<8x8xf32> to vector<8x8xbf16>
      %c0_134 = arith.constant 0 : index
      %c0_135 = arith.constant 0 : index
      %c16 = arith.constant 16 : index
      %202 = vector.load %arg7[%c0_134, %c0_135, %c16] : memref<1x8x32xbf16, #tpu.memory_space<vmem>>, vector<1x8x8xbf16>
      %203 = vector.shape_cast %202 : vector<1x8x8xbf16> to vector<8x8xbf16>
      %204 = vector.shape_cast %201 : vector<8x8xbf16> to vector<1x8x8xbf16>
      tpu.vector_store %arg7[%c0_134, %c0_135, %c16], %204 {strides = array<i32>} : memref<1x8x32xbf16, #tpu.memory_space<vmem>>, vector<1x8x8xbf16>,
      %c3_136 = arith.constant 3 : index
      %c0_137 = arith.constant 0 : index
      %c0_138 = arith.constant 0 : index
      %205 = vector.load %arg9[%c3_136, %c0_137, %c0_138] : memref<4x8x1xf32, #tpu.memory_space<vmem>>, vector<1x8x1xf32>
      %206 = vector.shape_cast %205 : vector<1x8x1xf32> to vector<8x1xf32>
      %207 = tpu.reciprocal %206 : vector<8x1xf32> -> vector<8x1xf32>
      %c3_139 = arith.constant 3 : index
      %c0_140 = arith.constant 0 : index
      %c0_141 = arith.constant 0 : index
      %208 = vector.load %arg10[%c3_139, %c0_140, %c0_141] : memref<4x8x8xf32, #tpu.memory_space<vmem>>, vector<1x8x8xf32>
      %209 = vector.shape_cast %208 : vector<1x8x8xf32> to vector<8x8xf32>
      %210 = vector.broadcast %207 : vector<8x1xf32> to vector<8x8xf32>
      %211 = arith.mulf %209, %210 : vector<8x8xf32>
      %212 = arith.truncf %211 : vector<8x8xf32> to vector<8x8xbf16>
      %c0_142 = arith.constant 0 : index
      %c0_143 = arith.constant 0 : index
      %c24 = arith.constant 24 : index
      %213 = vector.load %arg7[%c0_142, %c0_143, %c24] : memref<1x8x32xbf16, #tpu.memory_space<vmem>>, vector<1x8x8xbf16>
      %214 = vector.shape_cast %213 : vector<1x8x8xbf16> to vector<8x8xbf16>
      %215 = vector.shape_cast %212 : vector<8x8xbf16> to vector<1x8x8xbf16>
      tpu.vector_store %arg7[%c0_142, %c0_143, %c24], %215 {strides = array<i32>} : memref<1x8x32xbf16, #tpu.memory_space<vmem>>, vector<1x8x8xbf16>,
    } else {
    }
    return
  }
  func.func @transform_0(%arg0: i32, %arg1: i32, %arg2: i32) -> (i32, i32, i32) {
    %c0_i32 = arith.constant 0 : i32
    %c0_i32_0 = arith.constant 0 : i32
    return %arg0, %arg1, %c0_i32 : i32, i32, i32
  }
  func.func @transform_1(%arg0: i32, %arg1: i32, %arg2: i32) -> (i32, i32, i32) {
    %c0_i32 = arith.constant 0 : i32
    %c0_i32_0 = arith.constant 0 : i32
    return %arg0, %arg2, %c0_i32 : i32, i32, i32
  }
  func.func @transform_2(%arg0: i32, %arg1: i32, %arg2: i32) -> (i32, i32, i32) {
    %c0_i32 = arith.constant 0 : i32
    %c0_i32_0 = arith.constant 0 : i32
    return %arg0, %arg2, %c0_i32 : i32, i32, i32
  }
  func.func @transform_3(%arg0: i32, %arg1: i32, %arg2: i32) -> (i32, i32, i32, i32) {
    %c0_i32 = arith.constant 0 : i32
    %c0_i32_0 = arith.constant 0 : i32
    return %arg0, %c0_i32, %arg1, %arg2 : i32, i32, i32, i32
  }
  func.func @transform_4(%arg0: i32, %arg1: i32, %arg2: i32) -> (i32, i32, i32) {
    %c0_i32 = arith.constant 0 : i32
    %c0_i32_0 = arith.constant 0 : i32
    return %arg0, %arg1, %c0_i32 : i32, i32, i32
  }
}

module attributes {stable_mosaic.version = 11 : i64} {
  func.func @_matmul_ln_res_kernel(%arg0: i32, %arg1: i32, %arg2: memref<8x32xbf16, #tpu.memory_space<vmem>>, %arg3: memref<32x32xbf16, #tpu.memory_space<vmem>>, %arg4: memref<1x32xf32, #tpu.memory_space<vmem>>, %arg5: memref<1x32xf32, #tpu.memory_space<vmem>>, %arg6: memref<1x32xf32, #tpu.memory_space<vmem>>, %arg7: memref<8x32xf32, #tpu.memory_space<vmem>>, %arg8: memref<8x32xf32, #tpu.memory_space<vmem>>, %arg9: memref<8x32xf32, #tpu.memory_space<vmem>>) attributes {dimension_semantics = [#tpu.dimension_semantics<parallel>, #tpu.dimension_semantics<arbitrary>], iteration_bounds = array<i64: 2, 1>, scalar_prefetch = 0 : i64, scratch_operands = 1 : i64, tpu.core_type = #tpu.core_type<tc>, window_params = [{transform_indices = @transform_0, window_bounds = array<i64: 8, 32>}, {transform_indices = @transform_1, window_bounds = array<i64: 32, 32>}, {pipeline_mode = #tpu.pipeline_mode<synchronous>, transform_indices = @transform_2, window_bounds = array<i64: 1, 32>}, {pipeline_mode = #tpu.pipeline_mode<synchronous>, transform_indices = @transform_3, window_bounds = array<i64: 1, 32>}, {pipeline_mode = #tpu.pipeline_mode<synchronous>, transform_indices = @transform_4, window_bounds = array<i64: 1, 32>}, {transform_indices = @transform_5, window_bounds = array<i64: 8, 32>}, {transform_indices = @transform_6, window_bounds = array<i64: 8, 32>}]} {
    %c0_i32 = arith.constant 0 : i32
    %0 = arith.cmpi eq, %arg1, %c0_i32 : i32
    %1 = arith.extui %0 : i1 to i32
    %c0_i32_0 = arith.constant 0 : i32
    %2 = arith.cmpi ne, %1, %c0_i32_0 : i32
    scf.if %2 {
      %cst_10 = arith.constant 0.000000e+00 : f32
      %12 = vector.broadcast %cst_10 : f32 to vector<8x32xf32>
      %c0_11 = arith.constant 0 : index
      %c0_12 = arith.constant 0 : index
      %13 = vector.load %arg9[%c0_11, %c0_12] : memref<8x32xf32, #tpu.memory_space<vmem>>, vector<8x32xf32>
      tpu.vector_store %arg9[%c0_11, %c0_12], %12 {strides = array<i32>} : memref<8x32xf32, #tpu.memory_space<vmem>>, vector<8x32xf32>,
    } else {
    }
    %c0 = arith.constant 0 : index
    %c0_1 = arith.constant 0 : index
    %3 = vector.load %arg9[%c0, %c0_1] : memref<8x32xf32, #tpu.memory_space<vmem>>, vector<8x32xf32>
    %c0_2 = arith.constant 0 : index
    %c0_3 = arith.constant 0 : index
    %4 = vector.load %arg2[%c0_2, %c0_3] : memref<8x32xbf16, #tpu.memory_space<vmem>>, vector<8x32xbf16>
    %c0_4 = arith.constant 0 : index
    %c0_5 = arith.constant 0 : index
    %5 = vector.load %arg3[%c0_4, %c0_5] : memref<32x32xbf16, #tpu.memory_space<vmem>>, vector<32x32xbf16>
    %cst = arith.constant dense<0.000000e+00> : vector<8x32xf32>
    %6 = tpu.matmul %4, %5, %cst {dimension_numbers = #tpu.dot_dimension_numbers<[1], [0], [0], [1], [0, 0, 1, 1], [], []>} : vector<8x32xbf16>, vector<32x32xbf16>, vector<8x32xf32> -> vector<8x32xf32>
    %7 = arith.addf %3, %6 : vector<8x32xf32>
    %c0_6 = arith.constant 0 : index
    %c0_7 = arith.constant 0 : index
    %8 = vector.load %arg9[%c0_6, %c0_7] : memref<8x32xf32, #tpu.memory_space<vmem>>, vector<8x32xf32>
    tpu.vector_store %arg9[%c0_6, %c0_7], %7 {strides = array<i32>} : memref<8x32xf32, #tpu.memory_space<vmem>>, vector<8x32xf32>,
    %c0_i32_8 = arith.constant 0 : i32
    %9 = arith.cmpi eq, %arg1, %c0_i32_8 : i32
    %10 = arith.extui %9 : i1 to i32
    %c0_i32_9 = arith.constant 0 : i32
    %11 = arith.cmpi ne, %10, %c0_i32_9 : i32
    scf.if %11 {
      %c0_10 = arith.constant 0 : index
      %c0_11 = arith.constant 0 : index
      %12 = vector.load %arg9[%c0_10, %c0_11] : memref<8x32xf32, #tpu.memory_space<vmem>>, vector<8x32xf32>
      %c0_12 = arith.constant 0 : index
      %c0_13 = arith.constant 0 : index
      %13 = vector.load %arg4[%c0_12, %c0_13] : memref<1x32xf32, #tpu.memory_space<vmem>>, vector<1x32xf32>
      %14 = vector.broadcast %13 : vector<1x32xf32> to vector<8x32xf32>
      %15 = arith.addf %12, %14 : vector<8x32xf32>
      %cst_14 = arith.constant dense<0.000000e+00> : vector<8xf32>
      %16 = vector.multi_reduction <add>, %15, %cst_14 [1] : vector<8x32xf32> to vector<8xf32>
      %17 = vector.shape_cast %16 : vector<8xf32> to vector<8x1xf32>
      %cst_15 = arith.constant 3.200000e+01 : f32
      %18 = vector.broadcast %cst_15 : f32 to vector<8x1xf32>
      %19 = arith.divf %17, %18 : vector<8x1xf32>
      %20 = vector.broadcast %19 : vector<8x1xf32> to vector<8x32xf32>
      %21 = arith.subf %15, %20 : vector<8x32xf32>
      %22 = arith.mulf %21, %21 : vector<8x32xf32>
      %cst_16 = arith.constant dense<0.000000e+00> : vector<8xf32>
      %23 = vector.multi_reduction <add>, %22, %cst_16 [1] : vector<8x32xf32> to vector<8xf32>
      %24 = vector.shape_cast %23 : vector<8xf32> to vector<8x1xf32>
      %cst_17 = arith.constant 3.200000e+01 : f32
      %25 = vector.broadcast %cst_17 : f32 to vector<8x1xf32>
      %26 = arith.divf %24, %25 : vector<8x1xf32>
      %c0_18 = arith.constant 0 : index
      %c0_19 = arith.constant 0 : index
      %27 = vector.load %arg7[%c0_18, %c0_19] : memref<8x32xf32, #tpu.memory_space<vmem>>, vector<8x32xf32>
      %cst_20 = arith.constant 1.000000e-07 : f32
      %28 = vector.broadcast %cst_20 : f32 to vector<8x1xf32>
      %29 = arith.addf %26, %28 : vector<8x1xf32>
      %30 = math.rsqrt %29 : vector<8x1xf32>
      %31 = vector.broadcast %30 : vector<8x1xf32> to vector<8x32xf32>
      %32 = arith.mulf %21, %31 : vector<8x32xf32>
      %c0_21 = arith.constant 0 : index
      %c0_22 = arith.constant 0 : index
      %33 = vector.load %arg5[%c0_21, %c0_22] : memref<1x32xf32, #tpu.memory_space<vmem>>, vector<1x32xf32>
      %34 = vector.broadcast %33 : vector<1x32xf32> to vector<8x32xf32>
      %35 = arith.mulf %32, %34 : vector<8x32xf32>
      %36 = arith.addf %27, %35 : vector<8x32xf32>
      %c0_23 = arith.constant 0 : index
      %c0_24 = arith.constant 0 : index
      %37 = vector.load %arg6[%c0_23, %c0_24] : memref<1x32xf32, #tpu.memory_space<vmem>>, vector<1x32xf32>
      %38 = vector.broadcast %37 : vector<1x32xf32> to vector<8x32xf32>
      %39 = arith.addf %36, %38 : vector<8x32xf32>
      %c0_25 = arith.constant 0 : index
      %c0_26 = arith.constant 0 : index
      %40 = vector.load %arg8[%c0_25, %c0_26] : memref<8x32xf32, #tpu.memory_space<vmem>>, vector<8x32xf32>
      tpu.vector_store %arg8[%c0_25, %c0_26], %39 {strides = array<i32>} : memref<8x32xf32, #tpu.memory_space<vmem>>, vector<8x32xf32>,
    } else {
    }
    return
  }
  func.func @transform_0(%arg0: i32, %arg1: i32) -> (i32, i32) {
    %c0_i32 = arith.constant 0 : i32
    return %arg0, %arg1 : i32, i32
  }
  func.func @transform_1(%arg0: i32, %arg1: i32) -> (i32, i32) {
    %c0_i32 = arith.constant 0 : i32
    %c0_i32_0 = arith.constant 0 : i32
    return %arg1, %c0_i32 : i32, i32
  }
  func.func @transform_2(%arg0: i32, %arg1: i32) -> (i32, i32) {
    %c0_i32 = arith.constant 0 : i32
    %c0_i32_0 = arith.constant 0 : i32
    %c0_i32_1 = arith.constant 0 : i32
    return %c0_i32, %c0_i32_0 : i32, i32
  }
  func.func @transform_3(%arg0: i32, %arg1: i32) -> (i32, i32) {
    %c0_i32 = arith.constant 0 : i32
    %c0_i32_0 = arith.constant 0 : i32
    %c0_i32_1 = arith.constant 0 : i32
    return %c0_i32, %c0_i32_0 : i32, i32
  }
  func.func @transform_4(%arg0: i32, %arg1: i32) -> (i32, i32) {
    %c0_i32 = arith.constant 0 : i32
    %c0_i32_0 = arith.constant 0 : i32
    %c0_i32_1 = arith.constant 0 : i32
    return %c0_i32, %c0_i32_0 : i32, i32
  }
  func.func @transform_5(%arg0: i32, %arg1: i32) -> (i32, i32) {
    %c0_i32 = arith.constant 0 : i32
    %c0_i32_0 = arith.constant 0 : i32
    return %arg0, %c0_i32 : i32, i32
  }
  func.func @transform_6(%arg0: i32, %arg1: i32) -> (i32, i32) {
    %c0_i32 = arith.constant 0 : i32
    %c0_i32_0 = arith.constant 0 : i32
    return %arg0, %c0_i32 : i32, i32
  }
}

module attributes {stable_mosaic.version = 11 : i64} {
  func.func @_ffn_in_kernel(%arg0: i32, %arg1: i32, %arg2: memref<8x32xbf16, #tpu.memory_space<vmem>>, %arg3: memref<32x64xbf16, #tpu.memory_space<vmem>>, %arg4: memref<32x64xbf16, #tpu.memory_space<vmem>>, %arg5: memref<8x64xbf16, #tpu.memory_space<vmem>>, %arg6: memref<8x64xf32, #tpu.memory_space<vmem>>, %arg7: memref<8x64xf32, #tpu.memory_space<vmem>>) attributes {dimension_semantics = [#tpu.dimension_semantics<parallel>, #tpu.dimension_semantics<arbitrary>], iteration_bounds = array<i64: 2, 1>, scalar_prefetch = 0 : i64, scratch_operands = 2 : i64, tpu.core_type = #tpu.core_type<tc>, window_params = [{transform_indices = @transform_0, window_bounds = array<i64: 8, 32>}, {transform_indices = @transform_1, window_bounds = array<i64: 32, 64>}, {transform_indices = @transform_2, window_bounds = array<i64: 32, 64>}, {transform_indices = @transform_3, window_bounds = array<i64: 8, 64>}]} {
    %c0_i32 = arith.constant 0 : i32
    %0 = arith.cmpi eq, %arg1, %c0_i32 : i32
    %1 = arith.extui %0 : i1 to i32
    %c0_i32_0 = arith.constant 0 : i32
    %2 = arith.cmpi ne, %1, %c0_i32_0 : i32
    scf.if %2 {
      %cst_17 = arith.constant 0.000000e+00 : f32
      %17 = vector.broadcast %cst_17 : f32 to vector<8x64xf32>
      %c0_18 = arith.constant 0 : index
      %c0_19 = arith.constant 0 : index
      %18 = vector.load %arg6[%c0_18, %c0_19] : memref<8x64xf32, #tpu.memory_space<vmem>>, vector<8x64xf32>
      tpu.vector_store %arg6[%c0_18, %c0_19], %17 {strides = array<i32>} : memref<8x64xf32, #tpu.memory_space<vmem>>, vector<8x64xf32>,
      %cst_20 = arith.constant 0.000000e+00 : f32
      %19 = vector.broadcast %cst_20 : f32 to vector<8x64xf32>
      %c0_21 = arith.constant 0 : index
      %c0_22 = arith.constant 0 : index
      %20 = vector.load %arg7[%c0_21, %c0_22] : memref<8x64xf32, #tpu.memory_space<vmem>>, vector<8x64xf32>
      tpu.vector_store %arg7[%c0_21, %c0_22], %19 {strides = array<i32>} : memref<8x64xf32, #tpu.memory_space<vmem>>, vector<8x64xf32>,
    } else {
    }
    %c0 = arith.constant 0 : index
    %c0_1 = arith.constant 0 : index
    %3 = vector.load %arg2[%c0, %c0_1] : memref<8x32xbf16, #tpu.memory_space<vmem>>, vector<8x32xbf16>
    %c0_2 = arith.constant 0 : index
    %c0_3 = arith.constant 0 : index
    %4 = vector.load %arg6[%c0_2, %c0_3] : memref<8x64xf32, #tpu.memory_space<vmem>>, vector<8x64xf32>
    %c0_4 = arith.constant 0 : index
    %c0_5 = arith.constant 0 : index
    %5 = vector.load %arg3[%c0_4, %c0_5] : memref<32x64xbf16, #tpu.memory_space<vmem>>, vector<32x64xbf16>
    %cst = arith.constant dense<0.000000e+00> : vector<8x64xf32>
    %6 = tpu.matmul %3, %5, %cst {dimension_numbers = #tpu.dot_dimension_numbers<[1], [0], [0], [1], [0, 0, 1, 1], [], []>} : vector<8x32xbf16>, vector<32x64xbf16>, vector<8x64xf32> -> vector<8x64xf32>
    %7 = arith.addf %4, %6 : vector<8x64xf32>
    %c0_6 = arith.constant 0 : index
    %c0_7 = arith.constant 0 : index
    %8 = vector.load %arg6[%c0_6, %c0_7] : memref<8x64xf32, #tpu.memory_space<vmem>>, vector<8x64xf32>
    tpu.vector_store %arg6[%c0_6, %c0_7], %7 {strides = array<i32>} : memref<8x64xf32, #tpu.memory_space<vmem>>, vector<8x64xf32>,
    %c0_8 = arith.constant 0 : index
    %c0_9 = arith.constant 0 : index
    %9 = vector.load %arg7[%c0_8, %c0_9] : memref<8x64xf32, #tpu.memory_space<vmem>>, vector<8x64xf32>
    %c0_10 = arith.constant 0 : index
    %c0_11 = arith.constant 0 : index
    %10 = vector.load %arg4[%c0_10, %c0_11] : memref<32x64xbf16, #tpu.memory_space<vmem>>, vector<32x64xbf16>
    %cst_12 = arith.constant dense<0.000000e+00> : vector<8x64xf32>
    %11 = tpu.matmul %3, %10, %cst_12 {dimension_numbers = #tpu.dot_dimension_numbers<[1], [0], [0], [1], [0, 0, 1, 1], [], []>} : vector<8x32xbf16>, vector<32x64xbf16>, vector<8x64xf32> -> vector<8x64xf32>
    %12 = arith.addf %9, %11 : vector<8x64xf32>
    %c0_13 = arith.constant 0 : index
    %c0_14 = arith.constant 0 : index
    %13 = vector.load %arg7[%c0_13, %c0_14] : memref<8x64xf32, #tpu.memory_space<vmem>>, vector<8x64xf32>
    tpu.vector_store %arg7[%c0_13, %c0_14], %12 {strides = array<i32>} : memref<8x64xf32, #tpu.memory_space<vmem>>, vector<8x64xf32>,
    %c0_i32_15 = arith.constant 0 : i32
    %14 = arith.cmpi eq, %arg1, %c0_i32_15 : i32
    %15 = arith.extui %14 : i1 to i32
    %c0_i32_16 = arith.constant 0 : i32
    %16 = arith.cmpi ne, %15, %c0_i32_16 : i32
    scf.if %16 {
      %c0_17 = arith.constant 0 : index
      %c0_18 = arith.constant 0 : index
      %17 = vector.load %arg6[%c0_17, %c0_18] : memref<8x64xf32, #tpu.memory_space<vmem>>, vector<8x64xf32>
      %c0_19 = arith.constant 0 : index
      %c0_20 = arith.constant 0 : index
      %18 = vector.load %arg7[%c0_19, %c0_20] : memref<8x64xf32, #tpu.memory_space<vmem>>, vector<8x64xf32>
      %cst_21 = arith.constant 5.000000e-01 : f32
      %19 = vector.broadcast %cst_21 : f32 to vector<8x64xf32>
      %20 = arith.mulf %19, %18 : vector<8x64xf32>
      %cst_22 = arith.constant 4.471500e-02 : f32
      %21 = vector.broadcast %cst_22 : f32 to vector<8x64xf32>
      %22 = arith.mulf %21, %18 : vector<8x64xf32>
      %23 = arith.mulf %22, %18 : vector<8x64xf32>
      %24 = arith.mulf %23, %18 : vector<8x64xf32>
      %25 = arith.addf %18, %24 : vector<8x64xf32>
      %cst_23 = arith.constant 0.797884583 : f32
      %26 = vector.broadcast %cst_23 : f32 to vector<8x64xf32>
      %27 = arith.mulf %26, %25 : vector<8x64xf32>
      %28 = math.tanh %27 : vector<8x64xf32>
      %cst_24 = arith.constant 1.000000e+00 : f32
      %29 = vector.broadcast %cst_24 : f32 to vector<8x64xf32>
      %30 = arith.addf %29, %28 : vector<8x64xf32>
      %31 = arith.mulf %20, %30 : vector<8x64xf32>
      %32 = arith.mulf %17, %31 : vector<8x64xf32>
      %cst_25 = arith.constant dense<0.000000e+00> : vector<8xf32>
      %33 = vector.multi_reduction <add>, %32, %cst_25 [1] : vector<8x64xf32> to vector<8xf32>
      %34 = vector.shape_cast %33 : vector<8xf32> to vector<8x1xf32>
      %cst_26 = arith.constant 6.400000e+01 : f32
      %35 = vector.broadcast %cst_26 : f32 to vector<8x1xf32>
      %36 = arith.divf %34, %35 : vector<8x1xf32>
      %37 = vector.broadcast %36 : vector<8x1xf32> to vector<8x64xf32>
      %38 = arith.subf %32, %37 : vector<8x64xf32>
      %39 = arith.mulf %38, %38 : vector<8x64xf32>
      %cst_27 = arith.constant dense<0.000000e+00> : vector<8xf32>
      %40 = vector.multi_reduction <add>, %39, %cst_27 [1] : vector<8x64xf32> to vector<8xf32>
      %41 = vector.shape_cast %40 : vector<8xf32> to vector<8x1xf32>
      %cst_28 = arith.constant 6.400000e+01 : f32
      %42 = vector.broadcast %cst_28 : f32 to vector<8x1xf32>
      %43 = arith.divf %41, %42 : vector<8x1xf32>
      %cst_29 = arith.constant 1.000000e-07 : f32
      %44 = vector.broadcast %cst_29 : f32 to vector<8x1xf32>
      %45 = arith.addf %43, %44 : vector<8x1xf32>
      %46 = math.rsqrt %45 : vector<8x1xf32>
      %47 = vector.broadcast %46 : vector<8x1xf32> to vector<8x64xf32>
      %48 = arith.mulf %38, %47 : vector<8x64xf32>
      %49 = arith.truncf %48 : vector<8x64xf32> to vector<8x64xbf16>
      %c0_30 = arith.constant 0 : index
      %c0_31 = arith.constant 0 : index
      %50 = vector.load %arg5[%c0_30, %c0_31] : memref<8x64xbf16, #tpu.memory_space<vmem>>, vector<8x64xbf16>
      tpu.vector_store %arg5[%c0_30, %c0_31], %49 {strides = array<i32>} : memref<8x64xbf16, #tpu.memory_space<vmem>>, vector<8x64xbf16>,
    } else {
    }
    return
  }
  func.func @transform_0(%arg0: i32, %arg1: i32) -> (i32, i32) {
    %c0_i32 = arith.constant 0 : i32
    return %arg0, %arg1 : i32, i32
  }
  func.func @transform_1(%arg0: i32, %arg1: i32) -> (i32, i32) {
    %c0_i32 = arith.constant 0 : i32
    %c0_i32_0 = arith.constant 0 : i32
    return %arg1, %c0_i32 : i32, i32
  }
  func.func @transform_2(%arg0: i32, %arg1: i32) -> (i32, i32) {
    %c0_i32 = arith.constant 0 : i32
    %c0_i32_0 = arith.constant 0 : i32
    return %arg1, %c0_i32 : i32, i32
  }
  func.func @transform_3(%arg0: i32, %arg1: i32) -> (i32, i32) {
    %c0_i32 = arith.constant 0 : i32
    %c0_i32_0 = arith.constant 0 : i32
    return %arg0, %c0_i32 : i32, i32
  }
}

module attributes {stable_mosaic.version = 11 : i64} {
  func.func @_matmul_res_kernel(%arg0: i32, %arg1: i32, %arg2: i32, %arg3: memref<8x64xbf16, #tpu.memory_space<vmem>>, %arg4: memref<64x32xbf16, #tpu.memory_space<vmem>>, %arg5: memref<8x32xf32, #tpu.memory_space<vmem>>, %arg6: memref<8x32xf32, #tpu.memory_space<vmem>>, %arg7: memref<8x32xf32, #tpu.memory_space<vmem>>) attributes {dimension_semantics = [#tpu.dimension_semantics<parallel>, #tpu.dimension_semantics<parallel>, #tpu.dimension_semantics<arbitrary>], iteration_bounds = array<i64: 2, 1, 1>, scalar_prefetch = 0 : i64, scratch_operands = 1 : i64, tpu.core_type = #tpu.core_type<tc>, window_params = [{transform_indices = @transform_0, window_bounds = array<i64: 8, 64>}, {transform_indices = @transform_1, window_bounds = array<i64: 64, 32>}, {transform_indices = @transform_2, window_bounds = array<i64: 8, 32>}, {transform_indices = @transform_3, window_bounds = array<i64: 8, 32>}]} {
    %c0_i32 = arith.constant 0 : i32
    %0 = arith.cmpi eq, %arg2, %c0_i32 : i32
    %1 = arith.extui %0 : i1 to i32
    %c0_i32_0 = arith.constant 0 : i32
    %2 = arith.cmpi ne, %1, %c0_i32_0 : i32
    scf.if %2 {
      %cst_10 = arith.constant 0.000000e+00 : f32
      %12 = vector.broadcast %cst_10 : f32 to vector<8x32xf32>
      %c0_11 = arith.constant 0 : index
      %c0_12 = arith.constant 0 : index
      %13 = vector.load %arg7[%c0_11, %c0_12] : memref<8x32xf32, #tpu.memory_space<vmem>>, vector<8x32xf32>
      tpu.vector_store %arg7[%c0_11, %c0_12], %12 {strides = array<i32>} : memref<8x32xf32, #tpu.memory_space<vmem>>, vector<8x32xf32>,
    } else {
    }
    %c0 = arith.constant 0 : index
    %c0_1 = arith.constant 0 : index
    %3 = vector.load %arg7[%c0, %c0_1] : memref<8x32xf32, #tpu.memory_space<vmem>>, vector<8x32xf32>
    %c0_2 = arith.constant 0 : index
    %c0_3 = arith.constant 0 : index
    %4 = vector.load %arg3[%c0_2, %c0_3] : memref<8x64xbf16, #tpu.memory_space<vmem>>, vector<8x64xbf16>
    %c0_4 = arith.constant 0 : index
    %c0_5 = arith.constant 0 : index
    %5 = vector.load %arg4[%c0_4, %c0_5] : memref<64x32xbf16, #tpu.memory_space<vmem>>, vector<64x32xbf16>
    %cst = arith.constant dense<0.000000e+00> : vector<8x32xf32>
    %6 = tpu.matmul %4, %5, %cst {dimension_numbers = #tpu.dot_dimension_numbers<[1], [0], [0], [1], [0, 0, 1, 1], [], []>} : vector<8x64xbf16>, vector<64x32xbf16>, vector<8x32xf32> -> vector<8x32xf32>
    %7 = arith.addf %3, %6 : vector<8x32xf32>
    %c0_6 = arith.constant 0 : index
    %c0_7 = arith.constant 0 : index
    %8 = vector.load %arg7[%c0_6, %c0_7] : memref<8x32xf32, #tpu.memory_space<vmem>>, vector<8x32xf32>
    tpu.vector_store %arg7[%c0_6, %c0_7], %7 {strides = array<i32>} : memref<8x32xf32, #tpu.memory_space<vmem>>, vector<8x32xf32>,
    %c0_i32_8 = arith.constant 0 : i32
    %9 = arith.cmpi eq, %arg2, %c0_i32_8 : i32
    %10 = arith.extui %9 : i1 to i32
    %c0_i32_9 = arith.constant 0 : i32
    %11 = arith.cmpi ne, %10, %c0_i32_9 : i32
    scf.if %11 {
      %c0_10 = arith.constant 0 : index
      %c0_11 = arith.constant 0 : index
      %12 = vector.load %arg5[%c0_10, %c0_11] : memref<8x32xf32, #tpu.memory_space<vmem>>, vector<8x32xf32>
      %c0_12 = arith.constant 0 : index
      %c0_13 = arith.constant 0 : index
      %13 = vector.load %arg7[%c0_12, %c0_13] : memref<8x32xf32, #tpu.memory_space<vmem>>, vector<8x32xf32>
      %14 = arith.addf %12, %13 : vector<8x32xf32>
      %c0_14 = arith.constant 0 : index
      %c0_15 = arith.constant 0 : index
      %15 = vector.load %arg6[%c0_14, %c0_15] : memref<8x32xf32, #tpu.memory_space<vmem>>, vector<8x32xf32>
      tpu.vector_store %arg6[%c0_14, %c0_15], %14 {strides = array<i32>} : memref<8x32xf32, #tpu.memory_space<vmem>>, vector<8x32xf32>,
    } else {
    }
    return
  }
  func.func @transform_0(%arg0: i32, %arg1: i32, %arg2: i32) -> (i32, i32) {
    %c0_i32 = arith.constant 0 : i32
    return %arg0, %arg2 : i32, i32
  }
  func.func @transform_1(%arg0: i32, %arg1: i32, %arg2: i32) -> (i32, i32) {
    %c0_i32 = arith.constant 0 : i32
    return %arg2, %arg1 : i32, i32
  }
  func.func @transform_2(%arg0: i32, %arg1: i32, %arg2: i32) -> (i32, i32) {
    %c0_i32 = arith.constant 0 : i32
    return %arg0, %arg1 : i32, i32
  }
  func.func @transform_3(%arg0: i32, %arg1: i32, %arg2: i32) -> (i32, i32) {
    %c0_i32 = arith.constant 0 : i32
    return %arg0, %arg1 : i32, i32
  }
}

</mosaic_0001>

<bundles_post_ra>
// kernel: decoder_forward.32
= control target key start
LH: loop header
LB: loop body
LE: loop exit
PB: predicated region body
PF: predicated region fallthrough
CT: control target
= control target key end

     0   :  { %s221_s6 = smov 0   ;;  %s238_s0 = inlined_call_operand.vmem [shape: f32[16,32], index: 0, kind: input, shape index: {}]   ;;  %s239_s1 = inlined_call_operand.vmem [shape: bf16[16,32], index: 1, kind: output, shape index: {}]  }
   0x1 LB: > { %s184_s7 = sadd.s32 4294967295, %s209_s6   ;;  %p188_p0 = scmp.ge.s32.totalorder %s209_s6, 1  ;;  %s209_s6 = sphi %s221_s6, %s11_s6  }
   0x2   : > { %p86_p1 = scmp.lt.s32.totalorder %s209_s6, 3 }
   0x4   : > { %p87_p2 = pnand %p188_p0, %p86_p1 }
   0x5   : > { %p104_p3 = scmp.lt.s32.totalorder (!%p87_p2), %s184_s7, 1 }
   0x6   : > { %90 = sbr.rel (%p87_p2) target bundleno = 322 (0x142), region = 24 }
   0xb   : > { %s241_s7 = smov (!%p104_p3, %s184_s7), 1  ;;  %vm113_vm0 = vcmask 261120   ;;  %vm129_vm1 = vcmask 257024  }
   0xc   : > { %s189_s8 = sshll.u32 %s241_s7, 3  ;;  %s190_s12 = sshll.u32 %s241_s7, 2 }
   0xd   : > { %s107_s11 = scalar_lea.vmem %s238_s0, %s189_s8  ;;  %s111_s15 = scalar_lea.vmem %s239_s1, %s190_s12 }
   0xe   : > { %v112_v0 = vld [vmem:[%s107_s11] sm:$0xff] }
   0xf   : > { %v114_v1 = vsel %vm113_vm0, %v112_v0, 0.0 }
  0x10   : > { %115 = vadd.xlane.f32.xlu0 %v114_v1 }
  0x99   : > { %v116_v2 = vpop.xlane.xlu0 %115 }
  0x9a   : > { %v118_v3 = vmul.f32 0.03125, %v116_v2 }
  0x9c   : > { %v119_v4 = vsub.f32 %v112_v0, %v118_v3 }
  0x9e   : > { %v120_v5 = vmul.f32 %v119_v4, %v119_v4 }
  0xa0   : > { %v121_v6 = vsel %vm113_vm0, %v120_v5, 0.0 }
  0xa1   : > { %122 = vadd.xlane.f32.xlu0 %v121_v6 }
 0x12a   : > { %v123_v7 = vpop.xlane.xlu0 %122 }
 0x12b   : > { %v124_v8 = vmul.f32 0.03125, %v123_v7 }
 0x12d   : > { %v125_v9 = vadd.f32 1e-07, %v124_v8 }
 0x12f   : > { %201 = vrsqrt.f32 %v125_v9 }
 0x13c   : > { %v202_v10 = vpop.eup %201 }
 0x13d   : > { %v127_v11 = vmul.f32 %v202_v10, %v119_v4 }
 0x13f   : > { %v128_v12 = vpack.c.bf16 %v127_v11, %v127_v11 }
 0x141   : > { %130 = vst.msk [vmem:[%s111_s15] sm:$0xf] %vm129_vm1, %v128_v12 }
 0x142 PF: > { %s11_s6 = sadd.s32 1, %s209_s6  }
 0x143   : > { %p8_p4 = scmp.ge.s32.totalorder %s11_s6, 4  }
 0x145   :  { %10 = sbr.rel (!%p8_p4) target bundleno = 1 (0x1), region = 54 }

// kernel: decoder_forward.33
= control target key start
LH: loop header
LB: loop body
LE: loop exit
PB: predicated region body
PF: predicated region fallthrough
CT: control target
= control target key end

     0   :  { %s545_s12 = smov 0   ;;  %s547_s13 = smov 0   ;;  %s587_s0 = inlined_call_operand.vmem [shape: bf16[16,32], index: 0, kind: input, shape index: {}]   ;;  %s588_s1 = inlined_call_operand.vmem [shape: bf16[32,32], index: 1, kind: input, shape index: {}]   ;;  %s589_s2 = inlined_call_operand.vmem [shape: f32[1,32], index: 2, kind: input, shape index: {}]   ;;  %s590_s3 = inlined_call_operand.vmem [shape: bf16[16,32], index: 3, kind: output, shape index: {}]  }
   0x1   :  { %s549_s14 = smov 0  }
   0x2 LB: > { %s32_s15 = sadd.s32 1, %s517_s13  ;;  %p451_p0 = scmp.ge.s32.totalorder %s521_s14, 1  ;;  %s521_s14 = sphi %s549_s14, %s13_s14   ;;  %s517_s13 = sphi %s547_s13, %s592_s13   ;;  %s513_s12 = sphi %s545_s12, %s591_s12  }
   0x3   : > { %p34_p1 = scmp.ge.s32.totalorder %s32_s15, 2  ;;  %p186_p2 = scmp.lt.s32.totalorder %s521_s14, 3 }
   0x5   : > { %s594_s15 = smov (%p34_p1, %s32_s15), 0  ;;  %p187_p3 = pnand %p451_p0, %p186_p2 }
   0x6   : > { %p225_p4 = scmp.lt.s32.totalorder (!%p187_p3), %s513_s12, 1 }
   0x7   : > { %190 = sbr.rel (%p187_p3) target bundleno = 229 (0xe5), region = 32 }
   0xc   : > { %v497_v0 = vld [vmem:[%s588_s1 + $0x8] sm:$0xff]   ;;  %v523_v1 = vmov 0.0   ;;  %v498_v2 = vld [vmem:[%s588_s1] sm:$0xff]   ;;  %vm524_vm0 = vmmov 0   ;;  %vm256_vm1 = vcmask 261120   ;;  %s596_s12 = smov (!%p225_p4, %s513_s12), 1 }
   0xd   : > { %463 = vmatprep.subr.bf16.mxu0 %v523_v1  ;;  %467 = vmatprep.mubr.msk.bf16.mxu0 %vm524_vm0, %v523_v1  ;;  %257 = vst.msk [vmem:[#allocation2] sm:$0xff] %vm256_vm1, %v523_v1  ;;  %s452_s20 = sshll.u32 %s596_s12, 2  ;;  %v457_v10 = vld [vmem:[%s589_s2] ss:$0 sm:$0xff]  ;;  %vm335_vm2 = vcmask 257024  }
   0xe   : > { %464 = vmatpush3.bf16.msra.mxu0 %v497_v0  ;;  %s231_s23 = scalar_lea.vmem %s587_s0, %s452_s20  ;;  %s250_s28 = scalar_lea.vmem %s590_s3, %s452_s20 }
   0xf   : > { %465 = vmatprep.subr.bf16.mxu0 %v523_v1  ;;  %v259_v3 = vld [vmem:[%s231_s23] sm:$0xf] }
  0x12   : > { %466 = vmatpush3.bf16.msra.mxu0 %v498_v2 }
  0x14   : > { %v258_v4 = vld [vmem:[#allocation2] sm:$0xff] }
  0x15   : > { %468 = vmatmul.mubr.msk.bf16.vlgmr.msra.gmra.mxu0 %vm256_vm1, %v259_v3 }
  0xd5   : > { %v314_v5 = vpop.f32.mrf.mxu0 }
  0xd6   : > { %v320_v6 = vadd.f32 %v314_v5, %v258_v4 }
  0xd7   : > { %v469_v7 = vpop.f32.mrf.mxu0 }
  0xd8   : > { %321 = vst.msk [vmem:[#allocation2] sm:$0xff] %vm256_vm1, %v320_v6 }
  0xd9   : > { %v317_v8 = vpop.f32.mrf.mxu0 }
  0xdb   : > { %v470_v9 = vpop.f32.mrf.mxu0 }
  0xdf   : > { %v325_v11 = vld [vmem:[#allocation2] sm:$0xff] }
  0xe0   : > { %v333_v12 = vadd.f32 %v457_v10, %v325_v11 }
  0xe2   : > { %v334_v13 = vpack.c.bf16 %v333_v12, %v333_v12 }
  0xe4   : > { %336 = vst.msk [vmem:[%s250_s28] sm:$0xf] %vm335_vm2, %v334_v13 }
  0xe5 PF: > { %s13_s14 = sadd.s32 1, %s521_s14   ;;  %s591_s12 = smov %s517_s13 }
  0xe6   : > { %p10_p5 = scmp.ge.s32.totalorder %s13_s14, 4   ;;  %s592_s13 = smov %s594_s15 }
  0xe8   :  { %12 = sbr.rel (!%p10_p5) target bundleno = 2 (0x2), region = 76 }

// kernel: decoder_forward.37
= control target key start
LH: loop header
LB: loop body
LE: loop exit
PB: predicated region body
PF: predicated region fallthrough
CT: control target
= control target key end

     0   :  { %s636_s21 = smov 0   ;;  %s638_s22 = smov 0   ;;  %s697_s0 = inlined_call_operand.vmem [shape: bf16[16,32], index: 0, kind: input, shape index: {}]   ;;  %s698_s1 = inlined_call_operand.vmem [shape: bf16[32,32], index: 1, kind: input, shape index: {}]   ;;  %s699_s2 = inlined_call_operand.vmem [shape: f32[1,32], index: 2, kind: input, shape index: {}]   ;;  %s700_s3 = inlined_call_operand.vmem [shape: f32[1,32], index: 3, kind: input, shape index: {}]   ;;  %s701_s4 = inlined_call_operand.vmem [shape: f32[1,32], index: 4, kind: input, shape index: {}]   ;;  %s702_s5 = inlined_call_operand.vmem [shape: f32[16,32], index: 5, kind: input, shape index: {}]   ;;  %s703_s6 = inlined_call_operand.vmem [shape: f32[16,32], index: 6, kind: output, shape index: {}]  }
   0x1   :  { %s640_s23 = smov 0  }
   0x2 LB: > { %s28_s24 = sadd.s32 1, %s593_s22  ;;  %p522_p0 = scmp.ge.s32.totalorder %s597_s23, 1  ;;  %s597_s23 = sphi %s640_s23, %s16_s23   ;;  %s593_s22 = sphi %s638_s22, %s705_s22   ;;  %s589_s21 = sphi %s636_s21, %s704_s21  }
   0x3   : > { %p30_p1 = scmp.ge.s32.totalorder %s28_s24, 2  ;;  %p248_p2 = scmp.lt.s32.totalorder %s597_s23, 3 }
   0x5   : > { %s707_s24 = smov (%p30_p1, %s28_s24), 0  ;;  %p249_p3 = pnand %p522_p0, %p248_p2 }
   0x6   : > { %p288_p4 = scmp.lt.s32.totalorder (!%p249_p3), %s589_s21, 1 }
   0x7   : > { %252 = sbr.rel (%p249_p3) target bundleno = 537 (0x219), region = 44 }
   0xc   : > { %vm314_vm0 = vcmask 261120   ;;  %v599_v0 = vmov 0.0   ;;  %v571_v1 = vld [vmem:[%s698_s1 + $0x8] sm:$0xff]   ;;  %vm600_vm1 = vmmov 0   ;;  %v572_v2 = vld [vmem:[%s698_s1] sm:$0xff]   ;;  %s709_s21 = smov (!%p288_p4, %s589_s21), 1 }
   0xd   : > { %315 = vst.msk [vmem:[#allocation2] sm:$0xff] %vm314_vm0, %v599_v0  ;;  %537 = vmatprep.subr.bf16.mxu0 %v599_v0  ;;  %541 = vmatprep.mubr.msk.bf16.mxu0 %vm600_vm1, %v599_v0  ;;  %s523_s29 = sshll.u32 %s709_s21, 2  ;;  %v529_v10 = vld [vmem:[%s699_s2] ss:$0 sm:$0xff]  ;;  %s524_s11 = sshll.u32 %s709_s21, 3 }
   0xe   : > { %538 = vmatpush3.bf16.msra.mxu0 %v571_v1  ;;  %s294_s8 = scalar_lea.vmem %s697_s0, %s523_s29  ;;  %s304_s14 = scalar_lea.vmem %s702_s5, %s524_s11  ;;  %v530_v23 = vld [vmem:[%s700_s3] ss:$0 sm:$0xff] }
   0xf   : > { %539 = vmatprep.subr.bf16.mxu0 %v599_v0  ;;  %v317_v3 = vld [vmem:[%s294_s8] sm:$0xf]  ;;  %s308_s21 = scalar_lea.vmem %s703_s6, %s524_s11 }
  0x10   : > { %v403_v25 = vld [vmem:[%s304_s14] sm:$0xff] }
  0x11   : > { %v531_v27 = vld [vmem:[%s701_s4] ss:$0 sm:$0xff] }
  0x12   : > { %540 = vmatpush3.bf16.msra.mxu0 %v572_v2 }
  0x14   : > { %v316_v4 = vld [vmem:[#allocation2] sm:$0xff] }
  0x15   : > { %542 = vmatmul.mubr.msk.bf16.vlgmr.msra.gmra.mxu0 %vm314_vm0, %v317_v3 }
  0xd5   : > { %v372_v5 = vpop.f32.mrf.mxu0 }
  0xd6   : > { %v378_v6 = vadd.f32 %v372_v5, %v316_v4 }
  0xd7   : > { %v543_v7 = vpop.f32.mrf.mxu0 }
  0xd8   : > { %379 = vst.msk [vmem:[#allocation2] sm:$0xff] %vm314_vm0, %v378_v6 }
  0xd9   : > { %v375_v8 = vpop.f32.mrf.mxu0 }
  0xdb   : > { %v544_v9 = vpop.f32.mrf.mxu0 }
  0xdf   : > { %v383_v11 = vld [vmem:[#allocation2] sm:$0xff] }
  0xe0   : > { %v391_v12 = vadd.f32 %v529_v10, %v383_v11 }
  0xe2   : > { %v392_v13 = vsel %vm314_vm0, %v391_v12, 0.0 }
  0xe3   : > { %393 = vadd.xlane.f32.xlu0 %v392_v13 }
 0x16c   : > { %v394_v14 = vpop.xlane.xlu0 %393 }
 0x16d   : > { %v396_v15 = vmul.f32 0.03125, %v394_v14 }
 0x16f   : > { %v397_v16 = vsub.f32 %v391_v12, %v396_v15 }
 0x171   : > { %v398_v17 = vmul.f32 %v397_v16, %v397_v16 }
 0x173   : > { %v399_v18 = vsel %vm314_vm0, %v398_v17, 0.0 }
 0x174   : > { %400 = vadd.xlane.f32.xlu0 %v399_v18 }
 0x1fd   : > { %v401_v19 = vpop.xlane.xlu0 %400 }
 0x1fe   : > { %v402_v20 = vmul.f32 0.03125, %v401_v19 }
 0x200   : > { %v404_v21 = vadd.f32 1e-07, %v402_v20 }
 0x202   : > { %573 = vrsqrt.f32 %v404_v21 }
 0x20f   : > { %v574_v22 = vpop.eup %573 }
 0x210   : > { %v406_v24 = vmul.f32 %v574_v22, %v397_v16 }
 0x212   : > { %v414_v26 = vmul.f32 %v530_v23, %v406_v24 }
 0x214   : > { %v415_v28 = vadd.f32 %v414_v26, %v403_v25 }
 0x216   : > { %v423_v29 = vadd.f32 %v531_v27, %v415_v28 }
 0x218   : > { %424 = vst.msk [vmem:[%s308_s21] sm:$0xff] %vm314_vm0, %v423_v29 }
 0x219 PF: > { %s16_s23 = sadd.s32 1, %s597_s23   ;;  %s704_s21 = smov %s593_s22 }
 0x21a   : > { %p13_p5 = scmp.ge.s32.totalorder %s16_s23, 4   ;;  %s705_s22 = smov %s707_s24 }
 0x21c   :  { %15 = sbr.rel (!%p13_p5) target bundleno = 2 (0x2), region = 88 }

// kernel: decoder_forward.45
= control target key start
LH: loop header
LB: loop body
LE: loop exit
PB: predicated region body
PF: predicated region fallthrough
CT: control target
= control target key end

     0   :  { %s611_s12 = smov 0   ;;  %s613_s13 = smov 0   ;;  %s669_s0 = inlined_call_operand.vmem [shape: bf16[16,32], index: 0, kind: input, shape index: {}]   ;;  %s670_s1 = inlined_call_operand.vmem [shape: bf16[32,64], index: 1, kind: input, shape index: {}]   ;;  %s671_s2 = inlined_call_operand.vmem [shape: bf16[32,64], index: 2, kind: input, shape index: {}]   ;;  %s672_s3 = inlined_call_operand.vmem [shape: bf16[16,64], index: 3, kind: output, shape index: {}]  }
   0x1   :  { %s615_s14 = smov 0  }
   0x2 LB: > { %s25_s15 = sadd.s32 1, %s583_s13  ;;  %p498_p0 = scmp.ge.s32.totalorder %s587_s14, 1  ;;  %s587_s14 = sphi %s615_s14, %s13_s14   ;;  %s583_s13 = sphi %s613_s13, %s674_s13   ;;  %s579_s12 = sphi %s611_s12, %s673_s12  }
   0x3   : > { %p27_p1 = scmp.ge.s32.totalorder %s25_s15, 2  ;;  %p175_p2 = scmp.lt.s32.totalorder %s587_s14, 3 }
   0x5   : > { %s676_s15 = smov (%p27_p1, %s25_s15), 0  ;;  %p176_p3 = pnand %p498_p0, %p175_p2 }
   0x6   : > { %p210_p4 = scmp.lt.s32.totalorder (!%p176_p3), %s579_s12, 1 }
   0x7   : > { %179 = sbr.rel (%p176_p3) target bundleno = 561 (0x231), region = 32 }
   0xc   : > { %v557_v0 = vld [vmem:[%s671_s2 + $0x8] sm:$0xff]   ;;  %v589_v1 = vmov 0.0   ;;  %v558_v2 = vld [vmem:[%s671_s2] sm:$0xff]   ;;  %vm590_vm0 = vmmov 0   ;;  %vm238_vm1 = vcmask 523264   ;;  %s678_s12 = smov (!%p210_p4, %s579_s12), 1 }
   0xd   : > { %523 = vmatprep.subr.bf16.mxu1 %v589_v1  ;;  %515 = vmatprep.subr.bf16.mxu0 %v589_v1  ;;  %v559_v3 = vld [vmem:[%s670_s1 + $0x8] sm:$0xff]   ;;  %240 = vst.msk [vmem:[#allocation3] sm:$0xff] %vm238_vm1, %v589_v1  ;;  %239 = vst.msk [vmem:[#allocation2] sm:$0xff] %vm238_vm1, %v589_v1  ;;  %v560_v4 = vld [vmem:[%s670_s1] sm:$0xff]   ;;  %s499_s24 = sshll.u32 %s678_s12, 2  ;;  %vm259_vm2 = vcmask 261120  }
   0xe   : > { %524 = vmatpush3.bf16.msra.mxu1 %v557_v0  ;;  %527 = vmatprep.mubr.msk.bf16.mxu1 %vm590_vm0, %v589_v1  ;;  %s216_s27 = scalar_lea.vmem %s669_s0, %s499_s24  ;;  %s232_s30 = scalar_lea.vmem %s672_s3, %s499_s24  ;;  %vm395_vm3 = vcmask 519168  }
   0xf   : > { %525 = vmatprep.subr.bf16.mxu1 %v589_v1  ;;  %519 = vmatprep.mubr.msk.bf16.mxu0 %vm590_vm0, %v589_v1  ;;  %v241_v5 = vld [vmem:[%s216_s27] sm:$0xf] }
  0x10   : > { %516 = vmatpush3.bf16.msra.mxu0 %v559_v3 }
  0x11   : > { %517 = vmatprep.subr.bf16.mxu0 %v589_v1 }
  0x12   : > { %526 = vmatpush3.bf16.msra.mxu1 %v558_v2 }
  0x14   : > { %518 = vmatpush3.bf16.msra.mxu0 %v560_v4  ;;  %v306_v6 = vld [vmem:[#allocation3] sm:$0xff]  ;;  %v242_v9 = vld [vmem:[#allocation2] sm:$0xff] }
  0x15   : > { %528 = vmatmul.mubr.msk.bf16.vlgmr.msra.gmra.mxu1 %vm259_vm2, %v241_v5 }
  0x17   : > { %520 = vmatmul.mubr.msk.bf16.vlgmr.msra.gmra.mxu0 %vm259_vm2, %v241_v5 }
  0xd5   : > { %v357_v7 = vpop.f32.mrf.mxu1 }
  0xd6   : > { %v363_v8 = vadd.f32 %v357_v7, %v306_v6 }
  0xd7   : > { %v529_v10 = vpop.f32.mrf.mxu1  ;;  %v297_v11 = vpop.f32.mrf.mxu0 }
  0xd8   : > { %364 = vst.msk [vmem:[#allocation3] sm:$0xff] %vm238_vm1, %v363_v8  ;;  %v303_v13 = vadd.f32 %v297_v11, %v242_v9 }
  0xd9   : > { %v360_v12 = vpop.f32.mrf.mxu1  ;;  %v521_v14 = vpop.f32.mrf.mxu0 }
  0xda   : > { %305 = vst.msk [vmem:[#allocation2] sm:$0xff] %vm238_vm1, %v303_v13 }
  0xdb   : > { %v530_v15 = vpop.f32.mrf.mxu1  ;;  %v300_v16 = vpop.f32.mrf.mxu0 }
  0xdd   : > { %v522_v17 = vpop.f32.mrf.mxu0 }
  0xdf   : > { %v369_v18 = vld [vmem:[#allocation3] sm:$0xff] }
  0xe0   : > { %v371_v19 = vmul.f32 0.044715, %v369_v18  ;;  %v370_v25 = vmul.f32 0.5, %v369_v18 }
  0xe1   : > { %v368_v27 = vld [vmem:[#allocation2] sm:$0xff] }
  0xe2   : > { %v372_v20 = vmul.f32 %v371_v19, %v369_v18 }
  0xe4   : > { %v373_v21 = vmul.f32 %v372_v20, %v369_v18 }
  0xe6   : > { %v374_v22 = vadd.f32 %v373_v21, %v369_v18 }
  0xe8   : > { %v375_v23 = vmul.f32 0.7978846, %v374_v22 }
  0xea   : > { %561 = vtanh.f32 %v375_v23 }
  0xf7   : > { %v562_v24 = vpop.eup %561 }
  0xf8   : > { %v377_v26 = vadd.f32 1.0, %v562_v24 }
  0xfa   : > { %v378_v28 = vmul.f32 %v377_v26, %v370_v25 }
  0xfc   : > { %v379_v29 = vmul.f32 %v378_v28, %v368_v27 }
  0xfe   : > { %v380_v30 = vsel %vm238_vm1, %v379_v29, 0.0 }
  0xff   : > { %381 = vadd.xlane.f32.xlu0 %v380_v30 }
 0x188   : > { %v382_v31 = vpop.xlane.xlu0 %381 }
 0x189   : > { %v384_v32 = vmul.f32 0.015625, %v382_v31 }
 0x18b   : > { %v385_v33 = vsub.f32 %v379_v29, %v384_v32 }
 0x18d   : > { %v386_v34 = vmul.f32 %v385_v33, %v385_v33 }
 0x18f   : > { %v387_v35 = vsel %vm238_vm1, %v386_v34, 0.0 }
 0x190   : > { %388 = vadd.xlane.f32.xlu0 %v387_v35 }
 0x219   : > { %v389_v36 = vpop.xlane.xlu0 %388 }
 0x21a   : > { %v390_v37 = vmul.f32 0.015625, %v389_v36 }
 0x21c   : > { %v391_v38 = vadd.f32 1e-07, %v390_v37 }
 0x21e   : > { %563 = vrsqrt.f32 %v391_v38 }
 0x22b   : > { %v564_v39 = vpop.eup %563 }
 0x22c   : > { %v393_v40 = vmul.f32 %v564_v39, %v385_v33 }
 0x22e   : > { %v394_v41 = vpack.c.bf16 %v393_v40, %v393_v40 }
 0x230   : > { %396 = vst.msk [vmem:[%s232_s30] sm:$0xf] %vm395_vm3, %v394_v41 }
 0x231 PF: > { %s13_s14 = sadd.s32 1, %s587_s14   ;;  %s673_s12 = smov %s583_s13 }
 0x232   : > { %p10_p5 = scmp.ge.s32.totalorder %s13_s14, 4   ;;  %s674_s13 = smov %s676_s15 }
 0x234   :  { %12 = sbr.rel (!%p10_p5) target bundleno = 2 (0x2), region = 76 }

// kernel: decoder_forward.36
= control target key start
LH: loop header
LB: loop body
LE: loop exit
PB: predicated region body
PF: predicated region fallthrough
CT: control target
= control target key end

     0   :  { %s1321_s15 = smov 0   ;;  %s1323_s16 = smov 0   ;;  %s1506_s0 = inlined_call_operand.vmem [shape: bf16[2,8,32], index: 0, kind: input, shape index: {}]   ;;  %s1507_s1 = inlined_call_operand.vmem [shape: bf16[2,8,32], index: 1, kind: input, shape index: {}]   ;;  %s1508_s2 = inlined_call_operand.vmem [shape: bf16[2,8,32], index: 2, kind: input, shape index: {}]   ;;  %s1509_s3 = inlined_call_operand.vmem [shape: bf16[2,4,8,8], index: 3, kind: input, shape index: {}]   ;;  %s1510_s4 = inlined_call_operand.vmem [shape: bf16[2,8,32], index: 4, kind: output, shape index: {}]  }
   0x1   :  { %s1325_s17 = smov 0  }
   0x2 LB: > { %s33_s18 = sadd.s32 1, %s1280_s16  ;;  %p1106_p0 = scmp.ge.s32.totalorder %s1284_s17, 1  ;;  %s1284_s17 = sphi %s1325_s17, %s14_s17   ;;  %s1280_s16 = sphi %s1323_s16, %s1512_s16   ;;  %s1276_s15 = sphi %s1321_s15, %s1511_s15  }
   0x3   : > { %p35_p1 = scmp.ge.s32.totalorder %s33_s18, 2  ;;  %p235_p2 = scmp.lt.s32.totalorder %s1284_s17, 3 }
   0x5   : > { %s1514_s18 = smov (%p35_p1, %s33_s18), 0  ;;  %p236_p3 = pnand %p1106_p0, %p235_p2 }
   0x6   : > { %p290_p4 = scmp.lt.s32.totalorder (!%p236_p3), %s1276_s15, 1  ;;  %s1290_s30 = smov (!%p236_p3), 120  }
   0x7   : > { %239 = sbr.rel (%p236_p3) target bundleno = 1413 (0x585), region = 36  ;;  %s1291_s5 = smov (!%p236_p3), 112  }
   0x8   : > { %s1292_s6 = smov (!%p236_p3), 104   ;;  %s1293_s13 = smov (!%p236_p3), 8  }
   0x9   : > { %s1294_s14 = smov (!%p236_p3), 16  }
   0xc   : > { %vm343_vm0 = vcmask 64512   ;;  %v1286_v0 = vmov 0.0   ;;  %vm1287_vm1 = vmmov 0   ;;  %s1516_s15 = smov (!%p290_p4, %s1276_s15), 1  ;;  %vm334_vm2 = vcmask 7168  }
   0xd   : > { %1152 = vmatprep.subr.bf16.mxu0 %v1286_v0  ;;  %344 = vst.msk [vmem:[#allocation4] sm:$0xff] %vm343_vm0, %v1286_v0  ;;  %345 = vst.msk [vmem:[#allocation4 + $0x8] sm:$0xff] %vm343_vm0, %v1286_v0  ;;  %1154 = vmatprep.mubr.msk.bf16.mxu0 %vm1287_vm1, %v1286_v0  ;;  %s1353_s19 = sshll.u32 %s1516_s15, 2  ;;  %v1288_v4 = vmov -inf   ;;  %s1132_s26 = sshll.u32 %s1516_s15, 4  ;;  %v1289_v13 = vmov 0  }
   0xe   : > { %346 = vst.msk [vmem:[#allocation4 + $0x10] sm:$0xff] %vm343_vm0, %v1286_v0  ;;  %347 = vst.msk [vmem:[#allocation4 + $0x18] sm:$0xff] %vm343_vm0, %v1286_v0  ;;  %1158 = vmatprep.subr.bf16.mxu1 %v1286_v0  ;;  %1160 = vmatprep.mubr.msk.bf16.mxu1 %vm1287_vm1, %v1286_v0  ;;  %s303_s22 = scalar_lea.vmem %s1507_s1, %s1353_s19  ;;  %s296_s25 = scalar_lea.vmem %s1506_s0, %s1353_s19  ;;  %vm435_vm3 = vcmask 1043456   ;;  %vm918_vm4 = vcmask 60416   ;;  %vm936_vm5 = vcmask 126016   ;;  %vm954_vm6 = vcmask 191616  }
   0xf   : > { %v349_v1 = vld [vmem:[%s303_s22] sm:$0xf]  ;;  %335 = vst.msk [vmem:[#allocation2] sm:$0xff] %vm334_vm2, %v1288_v4  ;;  %336 = vst.msk [vmem:[#allocation2 + $0x8] sm:$0xff] %vm334_vm2, %v1288_v4  ;;  %s1383_s29 = scalar_lea.vmem %s1509_s3, %s1132_s26  ;;  %1234 = vset.pattern.permute.xlu0 %v1289_v13  ;;  %1235 = vset.pattern.permute.xlu1 %v1289_v13  ;;  %s310_s9 = scalar_lea.vmem %s1508_s2, %s1353_s19  ;;  %vm972_vm7 = vcmask 257216  }
  0x10   : > { %v358_v2 = vsel %vm343_vm0, %v349_v1, 0  ;;  %v348_v3 = vld [vmem:[%s296_s25] sm:$0xf]  ;;  %337 = vst.msk [vmem:[#allocation2 + $0x10] sm:$0xff] %vm334_vm2, %v1288_v4  ;;  %338 = vst.msk [vmem:[#allocation2 + $0x18] sm:$0xff] %vm334_vm2, %v1288_v4  ;;  %v1117_v14 = vcombine.low %v349_v1, %v349_v1  ;;  %v1121_v44 = vld [vmem:[%s1383_s29 + $0x8] sm:$0xff]   ;;  %s1490_s12 = scalar_lea.vmem %s1510_s4, %s1353_s19 }
  0x11   : > { %1153 = vmatpush3.bf16.xpose.msra.mxu0 %v358_v2  ;;  %339 = vst.msk [vmem:[#allocation3] sm:$0xff] %vm334_vm2, %v1286_v0  ;;  %340 = vst.msk [vmem:[#allocation3 + $0x8] sm:$0xff] %vm334_vm2, %v1286_v0  ;;  %v1386_v5 = vld [vmem:[%s1383_s29] sm:$0xff]   ;;  %v1116_v15 = vcombine.low %v348_v3, %v348_v3  ;;  %v631_v47 = vunpack.c.l.bf16 %v1121_v44  ;;  %v769_v54 = vunpack.c.h.bf16 %v1121_v44  ;;  %s1295_s15 = smov 24  }
  0x12   : > { %1170 = vmatprep.subr.bf16.mxu0 %v1286_v0  ;;  %341 = vst.msk [vmem:[#allocation3 + $0x10] sm:$0xff] %vm334_vm2, %v1286_v0  ;;  %342 = vst.msk [vmem:[#allocation3 + $0x18] sm:$0xff] %vm334_vm2, %v1286_v0  ;;  %v352_v6 = vunpack.c.l.bf16 %v1386_v5  ;;  %493 = vrot.lane.b32.xlu1 %v1117_v14, %s1290_s30  ;;  %v1410_v20 = vld [vmem:[%s310_s9] sm:$0xf]  ;;  %v484_v39 = vunpack.c.h.bf16 %v1386_v5 }
  0x13   : > { %v437_v21 = vsel %vm435_vm3, %v1410_v20, 0 }
  0x14   : > { %1159 = vmatpush3.bf16.msra.mxu1 %v437_v21 }
  0x15   : > { %1164 = vmatprep.subr.bf16.mxu1 %v1286_v0 }
  0x16   : > { %488 = vrot.lane.b32.xlu1 %v1116_v15, %s1290_s30  ;;  %v1396_v16 = vld [vmem:[#allocation2] sm:$0xff]  ;;  %v542_v62 = vld [vmem:[#allocation2 + $0x8] sm:$0xff] }
  0x18   : > { %1155 = vmatmul.mubr.msk.bf16.vlgmr.msra.gmra.mxu0 %vm343_vm0, %v348_v3  ;;  %v1442_v3 = vld [vmem:[#allocation2 + $0x10] sm:$0xff] }
  0x19   : > { %1172 = vmatprep.mubr.msk.bf16.mxu0 %vm1287_vm1, %v1286_v0 }
  0x1a   : > { %634 = vrot.lane.b32.xlu1 %v1117_v14, %s1291_s5 }
  0x1e   : > { %632 = vrot.lane.b32.xlu1 %v1116_v15, %s1291_s5 }
  0x22   : > { %772 = vrot.lane.b32.xlu1 %v1117_v14, %s1292_s6 }
  0x26   : > { %770 = vrot.lane.b32.xlu1 %v1116_v15, %s1292_s6 }
  0x84   : > { %v494_v25 = vpop.permute.xlu1 %493 }
  0x85   : > { %v499_v28 = vsel %vm343_vm0, %v494_v25, 0 }
  0x88   : > { %v489_v26 = vpop.permute.xlu1 %488 }
  0x8c   : > { %v635_v30 = vpop.permute.xlu1 %634 }
  0x8d   : > { %v640_v32 = vsel %vm343_vm0, %v635_v30, 0 }
  0x90   : > { %v633_v31 = vpop.permute.xlu1 %632 }
  0x94   : > { %v773_v33 = vpop.permute.xlu1 %772 }
  0x95   : > { %v778_v34 = vsel %vm343_vm0, %v773_v33, 0 }
  0x98   : > { %v771_v35 = vpop.permute.xlu1 %770 }
  0xd8   : > { %v394_v7 = vpop.f32.mrf.mxu0 }
  0xd9   : > { %v395_v8 = vadd.f32 %v394_v7, %v352_v6  ;;  %v821_v7 = vld [vmem:[#allocation2 + $0x18] sm:$0xff] }
  0xda   : > { %v1156_v9 = vpop.f32.mrf.mxu0 }
  0xdb   : > { %v401_v10 = vsel %vm343_vm0, %v395_v8, -inf }
  0xdc   : > { %402 = vmax.xlane.f32.xlu0 %v401_v10  ;;  %v397_v11 = vpop.f32.mrf.mxu0  ;;  %v1119_v10 = vcombine.low %v1410_v20, %v1410_v20 }
  0xde   : > { %v1157_v12 = vpop.f32.mrf.mxu0 }
 0x165   : > { %v403_v17 = vpop.xlane.xlu0 %402 }
 0x166   : > { %v1399_v18 = vmax.f32 %v1396_v16, %v403_v17 }
 0x168   : > { %v405_v19 = vsub.f32 %v1396_v16, %v1399_v18  ;;  %481 = vst.msk [vmem:[#allocation2] sm:$0xff] %vm334_vm2, %v1399_v18  ;;  %410 = vperm.xlu0 %1234, %v1399_v18  }
 0x1e3   : > { %v411_v22 = vpop.permute.xlu0 %410 }
 0x1e4   : > { %v413_v23 = vsub.f32 %v395_v8, %v411_v22 }
 0x1e6   : > { %v414_v24 = vmul.f32 1.442695, %v413_v23 }
 0x1e8   : > { %1238 = vpow2.f32 %v414_v24 }
 0x1f5   : > { %v1415_v27 = vpop.eup %1238 }
 0x1f6   : > { %v431_v29 = vpack.c.bf16 %v1415_v27, %v1415_v27  ;;  %v418_v12 = vsel %vm343_vm0, %v1415_v27, 0.0 }
 0x1f8   : > { %1161 = vmatmul.mubr.msk.bf16.vlgmr.msra.gmra.mxu1 %vm343_vm0, %v431_v29 }
 0x1f9   : > { %1165 = vmatpush3.bf16.xpose.msra.mxu1 %v499_v28  ;;  %1166 = vmatprep.mubr.msk.bf16.mxu1 %vm1287_vm1, %v1286_v0 }
 0x1fa   : > { %1176 = vmatprep.subr.bf16.mxu1 %v1286_v0 }
 0x200   : > { %1167 = vmatmul.mubr.msk.bf16.vlgmr.msra.gmra.mxu1 %vm343_vm0, %v489_v26 }
 0x201   : > { %1177 = vmatpush3.bf16.xpose.msra.mxu1 %v640_v32  ;;  %1178 = vmatprep.mubr.msk.bf16.mxu1 %vm1287_vm1, %v1286_v0 }
 0x202   : > { %1188 = vmatprep.subr.bf16.mxu1 %v1286_v0 }
 0x208   : > { %1179 = vmatmul.mubr.msk.bf16.vlgmr.msra.gmra.mxu1 %vm343_vm0, %v633_v31 }
 0x209   : > { %1189 = vmatpush3.bf16.xpose.msra.mxu1 %v778_v34  ;;  %1190 = vmatprep.mubr.msk.bf16.mxu1 %vm1287_vm1, %v1286_v0 }
 0x210   : > { %1191 = vmatmul.mubr.msk.bf16.vlgmr.msra.gmra.mxu1 %vm343_vm0, %v771_v35 }
 0x2b8   : > { %v1434_v36 = vpop.f32.mrf.mxu1 }
 0x2ba   : > { %v1162_v37 = vpop.f32.mrf.mxu1 }
 0x2bc   : > { %v476_v38 = vpop.f32.mrf.mxu1 }
 0x2be   : > { %v1163_v40 = vpop.f32.mrf.mxu1 }
 0x2c0   : > { %v535_v41 = vpop.f32.mrf.mxu1 }
 0x2c1   : > { %v536_v42 = vadd.f32 %v535_v41, %v484_v39 }
 0x2c2   : > { %v1168_v43 = vpop.f32.mrf.mxu1 }
 0x2c3   : > { %v543_v45 = vsel %vm343_vm0, %v536_v42, -inf  ;;  %v406_v43 = vmul.f32 1.442695, %v405_v19  ;;  %v559_v19 = vld [vmem:[#allocation3 + $0x8] sm:$0xff] }
 0x2c4   : > { %544 = vmax.xlane.f32.xlu1 %v543_v45  ;;  %v538_v46 = vpop.f32.mrf.mxu1 }
 0x2c6   : > { %v1169_v48 = vpop.f32.mrf.mxu1 }
 0x2c7   : > { %v416_v48 = vld [vmem:[#allocation3] sm:$0xff] }
 0x2c8   : > { %v676_v49 = vpop.f32.mrf.mxu1 }
 0x2c9   : > { %v677_v50 = vadd.f32 %v676_v49, %v631_v47 }
 0x2ca   : > { %v1180_v51 = vpop.f32.mrf.mxu1 }
 0x2cb   : > { %v684_v52 = vsel %vm343_vm0, %v677_v50, -inf }
 0x2cc   : > { %685 = vmax.xlane.f32.xlu0 %v684_v52  ;;  %v679_v53 = vpop.f32.mrf.mxu1 }
 0x2ce   : > { %v1181_v55 = vpop.f32.mrf.mxu1 }
 0x2cf   : > { %v700_v55 = vld [vmem:[#allocation3 + $0x10] sm:$0xff] }
 0x2d0   : > { %v814_v56 = vpop.f32.mrf.mxu1 }
 0x2d1   : > { %v815_v57 = vadd.f32 %v814_v56, %v769_v54 }
 0x2d2   : > { %v1192_v58 = vpop.f32.mrf.mxu1 }
 0x2d3   : > { %v822_v59 = vsel %vm343_vm0, %v815_v57, -inf }
 0x2d4   : > { %823 = vmax.xlane.f32.xlu1 %v822_v59  ;;  %v817_v60 = vpop.f32.mrf.mxu1 }
 0x2d5   : > { %v838_v60 = vld [vmem:[#allocation3 + $0x18] sm:$0xff] }
 0x2d6   : > { %v1193_v61 = vpop.f32.mrf.mxu1 }
 0x34d   : > { %v545_v63 = vpop.xlane.xlu1 %544 }
 0x34e   : > { %v546_v1 = vmax.f32 %v542_v62, %v545_v63 }
 0x350   : > { %v547_v2 = vsub.f32 %v542_v62, %v546_v1  ;;  %628 = vst.msk [vmem:[#allocation2 + $0x8] sm:$0xff] %vm334_vm2, %v546_v1  ;;  %552 = vperm.xlu1 %1235, %v546_v1  }
 0x352   : > { %v548_v33 = vmul.f32 1.442695, %v547_v2  ;;  %v424_v2 = vld [vmem:[#allocation4] sm:$0xff] }
 0x355   : > { %v686_v4 = vpop.xlane.xlu0 %685 }
 0x356   : > { %v1445_v5 = vmax.f32 %v1442_v3, %v686_v4 }
 0x358   : > { %v688_v6 = vsub.f32 %v1442_v3, %v1445_v5  ;;  %766 = vst.msk [vmem:[#allocation2 + $0x10] sm:$0xff] %vm334_vm2, %v1445_v5  ;;  %693 = vperm.xlu0 %1234, %v1445_v5  }
 0x35a   : > { %v689_v45 = vmul.f32 1.442695, %v688_v6 }
 0x35d   : > { %v824_v8 = vpop.xlane.xlu1 %823 }
 0x35e   : > { %v825_v9 = vmax.f32 %v821_v7, %v824_v8 }
 0x360   : > { %v826_v11 = vsub.f32 %v821_v7, %v825_v9  ;;  %904 = vst.msk [vmem:[#allocation2 + $0x18] sm:$0xff] %vm334_vm2, %v825_v9  ;;  %831 = vperm.xlu1 %1235, %v825_v9  }
 0x362   : > { %v827_v37 = vmul.f32 1.442695, %v826_v11 }
 0x364   : > { %578 = vrot.lane.b32.xlu1 %v1119_v10, %s1290_s30 }
 0x368   : > { %716 = vrot.lane.b32.xlu1 %v1119_v10, %s1291_s5 }
 0x36c   : > { %854 = vrot.lane.b32.xlu1 %v1119_v10, %s1292_s6  ;;  %v567_v10 = vld [vmem:[#allocation4 + $0x8] sm:$0xff] }
 0x390   : > { %419 = vadd.xlane.f32.xlu1 %v418_v12 }
 0x3cb   : > { %v553_v13 = vpop.permute.xlu1 %552 }
 0x3cc   : > { %v555_v14 = vsub.f32 %v536_v42, %v553_v13 }
 0x3ce   : > { %v556_v15 = vmul.f32 1.442695, %v555_v14 }
 0x3d0   : > { %1240 = vpow2.f32 %v556_v15 }
 0x3d3   : > { %v694_v17 = vpop.permute.xlu0 %693 }
 0x3d4   : > { %v696_v20 = vsub.f32 %v677_v50, %v694_v17  ;;  %v708_v17 = vld [vmem:[#allocation4 + $0x10] sm:$0xff] }
 0x3d6   : > { %v697_v21 = vmul.f32 1.442695, %v696_v20 }
 0x3d8   : > { %1242 = vpow2.f32 %v697_v21 }
 0x3db   : > { %v832_v22 = vpop.permute.xlu1 %831 }
 0x3dc   : > { %v834_v23 = vsub.f32 %v815_v57, %v832_v22 }
 0x3dd   : > { %v1241_v24 = vpop.eup %1240 }
 0x3de   : > { %v835_v25 = vmul.f32 1.442695, %v834_v23  ;;  %v561_v26 = vsel %vm343_vm0, %v1241_v24, 0.0  ;;  %v574_v29 = vpack.c.bf16 %v1241_v24, %v1241_v24 }
 0x3df   : > { %562 = vadd.xlane.f32.xlu0 %v561_v26  ;;  %v579_v28 = vpop.permute.xlu1 %578 }
 0x3e0   : > { %1244 = vpow2.f32 %v835_v25  ;;  %v584_v27 = vsel %vm435_vm3, %v579_v28, 0 }
 0x3e1   : > { %1171 = vmatpush3.bf16.msra.mxu0 %v584_v27  ;;  %1246 = vpow2.f32 %v548_v33 }
 0x3e2   : > { %1182 = vmatprep.subr.bf16.mxu0 %v1286_v0  ;;  %1248 = vpow2.f32 %v827_v37 }
 0x3e3   : > { %v717_v30 = vpop.permute.xlu1 %716  ;;  %1250 = vpow2.f32 %v406_v43 }
 0x3e4   : > { %1173 = vmatmul.mubr.msk.bf16.vlgmr.msra.gmra.mxu0 %vm343_vm0, %v574_v29  ;;  %v722_v31 = vsel %vm435_vm3, %v717_v30, 0  ;;  %1252 = vpow2.f32 %v689_v45  ;;  %v846_v30 = vld [vmem:[#allocation4 + $0x18] sm:$0xff] }
 0x3e5   : > { %v1243_v32 = vpop.eup %1242  ;;  %1183 = vmatpush3.bf16.msra.mxu0 %v722_v31  ;;  %1184 = vmatprep.mubr.msk.bf16.mxu0 %vm1287_vm1, %v1286_v0 }
 0x3e6   : > { %v702_v34 = vsel %vm343_vm0, %v1243_v32, 0.0  ;;  %1194 = vmatprep.subr.bf16.mxu0 %v1286_v0  ;;  %v715_v38 = vpack.c.bf16 %v1243_v32, %v1243_v32 }
 0x3e7   : > { %703 = vadd.xlane.f32.xlu1 %v702_v34  ;;  %v855_v35 = vpop.permute.xlu1 %854 }
 0x3e8   : > { %v860_v39 = vsel %vm435_vm3, %v855_v35, 0 }
 0x3ec   : > { %1185 = vmatmul.mubr.msk.bf16.vlgmr.msra.gmra.mxu0 %vm343_vm0, %v715_v38 }
 0x3ed   : > { %v1245_v40 = vpop.eup %1244  ;;  %1195 = vmatpush3.bf16.msra.mxu0 %v860_v39  ;;  %1196 = vmatprep.mubr.msk.bf16.mxu0 %vm1287_vm1, %v1286_v0 }
 0x3ee   : > { %v840_v41 = vsel %vm343_vm0, %v1245_v40, 0.0  ;;  %v853_v42 = vpack.c.bf16 %v1245_v40, %v1245_v40  ;;  %v1247_v44 = vpop.eup %1246 }
 0x3ef   : > { %841 = vadd.xlane.f32.xlu0 %v840_v41  ;;  %v1249_v46 = vpop.eup %1248  ;;  %v560_v52 = vmul.f32 %v1247_v44, %v559_v19 }
 0x3f0   : > { %v1251_v47 = vpop.eup %1250  ;;  %v839_v61 = vmul.f32 %v1249_v46, %v838_v60 }
 0x3f1   : > { %v1253_v0 = vpop.eup %1252  ;;  %v417_v49 = vmul.f32 %v1251_v47, %v416_v48 }
 0x3f2   : > { %v701_v56 = vmul.f32 %v1253_v0, %v700_v55 }
 0x3f4   : > { %1197 = vmatmul.mubr.msk.bf16.vlgmr.msra.gmra.mxu0 %vm343_vm0, %v853_v42 }
 0x3f8   : > { %570 = vperm.xlu1 %1235, %v1247_v44  }
 0x3fc   : > { %849 = vperm.xlu1 %1235, %v1249_v46  }
 0x405   : > { %427 = vperm.xlu0 %1234, %v1251_v47  }
 0x409   : > { %711 = vperm.xlu0 %1234, %v1253_v0  }
 0x419   : > { %v420_v50 = vpop.xlane.xlu1 %419 }
 0x41a   : > { %v421_v51 = vadd.f32 %v420_v50, %v417_v49 }
 0x41c   : > { %423 = vst.msk [vmem:[#allocation3] sm:$0xff] %vm334_vm2, %v421_v51 }
 0x423   : > { %v908_v16 = vld [vmem:[#allocation3] sm:$0xff] }
 0x424   : > { %1254 = vrcp.f32 %v908_v16 }
 0x431   : > { %v1255_v18 = vpop.eup %1254 }
 0x432   : > { %913 = vperm.xlu1 %1235, %v1255_v18  }
 0x468   : > { %v563_v53 = vpop.xlane.xlu0 %562 }
 0x469   : > { %v564_v54 = vadd.f32 %v563_v53, %v560_v52 }
 0x46b   : > { %565 = vst.msk [vmem:[#allocation3 + $0x8] sm:$0xff] %vm334_vm2, %v564_v54 }
 0x470   : > { %v704_v57 = vpop.xlane.xlu1 %703 }
 0x471   : > { %v705_v58 = vadd.f32 %v704_v57, %v701_v56 }
 0x472   : > { %v920_v59 = vld [vmem:[#allocation3 + $0x8] sm:$0xff] }
 0x473   : > { %706 = vst.msk [vmem:[#allocation3 + $0x10] sm:$0xff] %vm334_vm2, %v705_v58  ;;  %1256 = vrcp.f32 %v920_v59 }
 0x474   : > { %v571_v11 = vpop.permute.xlu1 %570 }
 0x475   : > { %v573_v12 = vmul.f32 %v571_v11, %v567_v10 }
 0x478   : > { %v842_v62 = vpop.xlane.xlu0 %841 }
 0x479   : > { %v843_v63 = vadd.f32 %v842_v62, %v839_v61 }
 0x47a   : > { %v938_v1 = vld [vmem:[#allocation3 + $0x10] sm:$0xff] }
 0x47b   : > { %844 = vst.msk [vmem:[#allocation3 + $0x18] sm:$0xff] %vm334_vm2, %v843_v63  ;;  %1258 = vrcp.f32 %v938_v1 }
 0x480   : > { %v1257_v3 = vpop.eup %1256  ;;  %v428_v4 = vpop.permute.xlu0 %427 }
 0x481   : > { %v430_v5 = vmul.f32 %v428_v4, %v424_v2  ;;  %925 = vperm.xlu0 %1234, %v1257_v3  }
 0x482   : > { %v956_v6 = vld [vmem:[#allocation3 + $0x18] sm:$0xff] }
 0x483   : > { %v479_v7 = vadd.f32 %v1434_v36, %v430_v5  ;;  %1260 = vrcp.f32 %v956_v6  ;;  %v850_v36 = vpop.permute.xlu1 %849 }
 0x484   : > { %v712_v20 = vpop.permute.xlu0 %711  ;;  %v852_v34 = vmul.f32 %v850_v36, %v846_v30 }
 0x485   : > { %480 = vst.msk [vmem:[#allocation4] sm:$0xff] %vm343_vm0, %v479_v7  ;;  %v714_v23 = vmul.f32 %v712_v20, %v708_v17 }
 0x488   : > { %v1259_v8 = vpop.eup %1258 }
 0x489   : > { %943 = vperm.xlu0 %1234, %v1259_v8  }
 0x48c   : > { %v910_v26 = vld [vmem:[#allocation4] sm:$0xff] }
 0x490   : > { %v1261_v9 = vpop.eup %1260 }
 0x491   : > { %961 = vperm.xlu0 %1234, %v1261_v9  }
 0x4a4   : > { %v620_v13 = vpop.f32.mrf.mxu0 }
 0x4a5   : > { %v626_v14 = vadd.f32 %v620_v13, %v573_v12 }
 0x4a6   : > { %v1174_v15 = vpop.f32.mrf.mxu0 }
 0x4a7   : > { %627 = vst.msk [vmem:[#allocation4 + $0x8] sm:$0xff] %vm343_vm0, %v626_v14 }
 0x4a8   : > { %v623_v21 = vpop.f32.mrf.mxu0 }
 0x4aa   : > { %v1175_v22 = vpop.f32.mrf.mxu0 }
 0x4ac   : > { %v758_v24 = vpop.f32.mrf.mxu0 }
 0x4ad   : > { %v764_v25 = vadd.f32 %v758_v24, %v714_v23  ;;  %v914_v28 = vpop.permute.xlu1 %913 }
 0x4ae   : > { %v916_v27 = vmul.f32 %v914_v28, %v910_v26  ;;  %v1186_v29 = vpop.f32.mrf.mxu0  ;;  %v922_v42 = vld [vmem:[#allocation4 + $0x8] sm:$0xff] }
 0x4af   : > { %765 = vst.msk [vmem:[#allocation4 + $0x10] sm:$0xff] %vm343_vm0, %v764_v25 }
 0x4b0   : > { %v917_v31 = vpack.c.bf16 %v916_v27, %v916_v27  ;;  %v761_v32 = vpop.f32.mrf.mxu0 }
 0x4b2   : > { %919 = vst.msk [vmem:[%s1490_s12] sm:$0xf] %vm918_vm4, %v917_v31  ;;  %v1187_v33 = vpop.f32.mrf.mxu0 }
 0x4b4   : > { %v896_v35 = vpop.f32.mrf.mxu0 }
 0x4b5   : > { %v902_v37 = vadd.f32 %v896_v35, %v852_v34 }
 0x4b6   : > { %v1198_v38 = vpop.f32.mrf.mxu0  ;;  %v940_v46 = vld [vmem:[#allocation4 + $0x10] sm:$0xff] }
 0x4b7   : > { %903 = vst.msk [vmem:[#allocation4 + $0x18] sm:$0xff] %vm343_vm0, %v902_v37 }
 0x4b8   : > { %v899_v39 = vpop.f32.mrf.mxu0 }
 0x4ba   : > { %v1199_v40 = vpop.f32.mrf.mxu0 }
 0x4be   : > { %v958_v49 = vld [vmem:[#allocation4 + $0x18] sm:$0xff] }
 0x4fc   : > { %v926_v41 = vpop.permute.xlu0 %925 }
 0x4fd   : > { %v928_v43 = vmul.f32 %v926_v41, %v922_v42 }
 0x4ff   : > { %v1133_v44 = vpack.c.bf16 %v928_v43, %v928_v43 }
 0x501   : > { %933 = vrot.lane.b32.xlu1 %v1133_v44, %s1293_s13 }
 0x504   : > { %v944_v45 = vpop.permute.xlu0 %943 }
 0x505   : > { %v946_v47 = vmul.f32 %v944_v45, %v940_v46 }
 0x507   : > { %v1134_v0 = vpack.c.bf16 %v946_v47, %v946_v47 }
 0x509   : > { %951 = vrot.lane.b32.xlu1 %v1134_v0, %s1294_s14 }
 0x50c   : > { %v962_v48 = vpop.permute.xlu0 %961 }
 0x50d   : > { %v964_v50 = vmul.f32 %v962_v48, %v958_v49 }
 0x50f   : > { %v1135_v51 = vpack.c.bf16 %v964_v50, %v964_v50 }
 0x511   : > { %969 = vrot.lane.b32.xlu1 %v1135_v51, %s1295_s15 }
 0x573   : > { %v934_v16 = vpop.permute.xlu1 %933 }
 0x574   : > { %937 = vst.msk [vmem:[%s1490_s12] sm:$0xf] %vm936_vm5, %v934_v16 }
 0x57b   : > { %v952_v18 = vpop.permute.xlu1 %951 }
 0x57c   : > { %955 = vst.msk [vmem:[%s1490_s12] sm:$0xf] %vm954_vm6, %v952_v18 }
 0x583   : > { %v970_v19 = vpop.permute.xlu1 %969 }
 0x584   : > { %973 = vst.msk [vmem:[%s1490_s12] sm:$0xf] %vm972_vm7, %v970_v19 }
 0x585 PF: > { %s14_s17 = sadd.s32 1, %s1284_s17   ;;  %s1511_s15 = smov %s1280_s16 }
 0x586   : > { %p11_p5 = scmp.ge.s32.totalorder %s14_s17, 4   ;;  %s1512_s16 = smov %s1514_s18 }
 0x588   :  { %13 = sbr.rel (!%p11_p5) target bundleno = 2 (0x2), region = 95 }

// kernel: decoder_forward.46
= control target key start
LH: loop header
LB: loop body
LE: loop exit
PB: predicated region body
PF: predicated region fallthrough
CT: control target
= control target key end

     0   :  { %s580_s12 = smov 0   ;;  %s582_s13 = smov 0   ;;  %s631_s0 = inlined_call_operand.vmem [shape: bf16[16,64], index: 0, kind: input, shape index: {}]   ;;  %s632_s1 = inlined_call_operand.vmem [shape: bf16[64,32], index: 1, kind: input, shape index: {}]   ;;  %s633_s2 = inlined_call_operand.vmem [shape: f32[16,32], index: 2, kind: input, shape index: {}]   ;;  %s634_s3 = inlined_call_operand.vmem [shape: f32[16,32], index: 3, kind: output, shape index: {}]  }
   0x1   :  { %s584_s14 = smov 0  }
   0x2 LB: > { %s32_s15 = sadd.s32 1, %s552_s13  ;;  %p476_p0 = scmp.ge.s32.totalorder %s556_s14, 1  ;;  %s556_s14 = sphi %s584_s14, %s13_s14   ;;  %s552_s13 = sphi %s582_s13, %s636_s13   ;;  %s548_s12 = sphi %s580_s12, %s635_s12  }
   0x3   : > { %p34_p1 = scmp.ge.s32.totalorder %s32_s15, 2  ;;  %p192_p2 = scmp.lt.s32.totalorder %s556_s14, 3 }
   0x5   : > { %s638_s15 = smov (%p34_p1, %s32_s15), 0  ;;  %p193_p3 = pnand %p476_p0, %p192_p2 }
   0x6   : > { %p235_p4 = scmp.lt.s32.totalorder (!%p193_p3), %s548_s12, 1 }
   0x7   : > { %196 = sbr.rel (%p193_p3) target bundleno = 235 (0xeb), region = 32 }
   0xc   : > { %v530_v0 = vld [vmem:[%s632_s1 + $0x18] sm:$0xff]   ;;  %v558_v1 = vmov 0.0   ;;  %v531_v2 = vld [vmem:[%s632_s1 + $0x10] sm:$0xff]   ;;  %vm559_vm0 = vmmov 0   ;;  %s640_s12 = smov (!%p235_p4, %s548_s12), 1  ;;  %vm270_vm1 = vcmask 261120  }
   0xd   : > { %492 = vmatprep.subr.bf16.mxu0 %v558_v1  ;;  %500 = vmatprep.mubr.msk.bf16.mxu0 %vm559_vm0, %v558_v1  ;;  %271 = vst.msk [vmem:[#allocation2] sm:$0xff] %vm270_vm1, %v558_v1  ;;  %v532_v3 = vld [vmem:[%s632_s1 + $0x8] sm:$0xff]   ;;  %s477_s22 = sshll.u32 %s640_s12, 2  ;;  %v533_v4 = vld [vmem:[%s632_s1] sm:$0xff]   ;;  %vm306_vm2 = vcmask 523264   ;;  %s478_s28 = sshll.u32 %s640_s12, 3 }
   0xe   : > { %493 = vmatpush3.bf16.msra.mxu0 %v530_v0  ;;  %s241_s27 = scalar_lea.vmem %s631_s0, %s477_s22  ;;  %s257_s4 = scalar_lea.vmem %s633_s2, %s478_s28 }
   0xf   : > { %494 = vmatprep.subr.bf16.mxu0 %v558_v1  ;;  %v273_v5 = vld [vmem:[%s241_s27] sm:$0xf]  ;;  %s264_s7 = scalar_lea.vmem %s634_s3, %s478_s28 }
  0x10   : > { %v356_v12 = vld [vmem:[%s257_s4] sm:$0xff] }
  0x12   : > { %495 = vmatpush3.bf16.msra.mxu0 %v531_v2 }
  0x13   : > { %496 = vmatprep.subr.bf16.mxu0 %v558_v1 }
  0x14   : > { %v272_v6 = vld [vmem:[#allocation2] sm:$0xff] }
  0x16   : > { %497 = vmatpush3.bf16.msra.mxu0 %v532_v3 }
  0x17   : > { %498 = vmatprep.subr.bf16.mxu0 %v558_v1 }
  0x1a   : > { %499 = vmatpush3.bf16.msra.mxu0 %v533_v4 }
  0x1d   : > { %501 = vmatmul.mubr.msk.bf16.vlgmr.msra.gmra.mxu0 %vm306_vm2, %v273_v5 }
  0xdd   : > { %v344_v7 = vpop.f32.mrf.mxu0 }
  0xde   : > { %v350_v8 = vadd.f32 %v344_v7, %v272_v6 }
  0xdf   : > { %v502_v9 = vpop.f32.mrf.mxu0 }
  0xe0   : > { %352 = vst.msk [vmem:[#allocation2] sm:$0xff] %vm270_vm1, %v350_v8 }
  0xe1   : > { %v347_v10 = vpop.f32.mrf.mxu0 }
  0xe3   : > { %v503_v11 = vpop.f32.mrf.mxu0 }
  0xe7   : > { %v357_v13 = vld [vmem:[#allocation2] sm:$0xff] }
  0xe8   : > { %v358_v14 = vadd.f32 %v357_v13, %v356_v12 }
  0xea   : > { %359 = vst.msk [vmem:[%s264_s7] sm:$0xff] %vm270_vm1, %v358_v14 }
  0xeb PF: > { %s13_s14 = sadd.s32 1, %s556_s14   ;;  %s635_s12 = smov %s552_s13 }
  0xec   : > { %p10_p5 = scmp.ge.s32.totalorder %s13_s14, 4   ;;  %s636_s13 = smov %s638_s15 }
  0xee   :  { %12 = sbr.rel (!%p10_p5) target bundleno = 2 (0x2), region = 76 }

</bundles_post_ra>
